<compile_context>
chip_gen: v7x
topology: tpu7x:2x2x1
jax: 0.10.0
libtpu: 0.0.40
codegen_flags: <defaults>
</compile_context>

<pallas_src>
import jax
import jax.numpy as jnp
from jax import lax
from jax.experimental import pallas as pl
from jax.experimental.pallas import tpu as pltpu

MATMUL_DTYPE = jnp.bfloat16      # MXU operand dtype; accumulation / gates / h / c stay f32
GATE_STORE_DTYPE = jnp.bfloat16  # dtype of the precomputed x@Wx+b intermediate in HBM


# --------------------------------------------------------------------------- kernels
def inproj_kernel(x_ref, wxf_ref, bf_ref, wxb_ref, bb_ref, gf_ref, gb_ref):
    """Fused-gate input projection x @ [Wi|Wf|Wg|Wo] + b for a flat row tile, both dirs.

    x_ref : (TR, E) tile of the flattened (S*B, E) time-major embedded input (bf16).
    gf/gb : (TR, 4U) gate pre-activations [i|f|g|o], stored in GATE_STORE_DTYPE.
    """
    x = x_ref[...]
    gf = jnp.dot(x, wxf_ref[...], preferred_element_type=jnp.float32) + bf_ref[...]
    gb = jnp.dot(x, wxb_ref[...], preferred_element_type=jnp.float32) + bb_ref[...]
    gf_ref[...] = gf.astype(gf_ref.dtype)
    gb_ref[...] = gb.astype(gb_ref.dtype)


def bilstm_recurrent_kernel(gxf_ref, gxb_ref, whf_ref, whb_ref,
                            outf_ref, outb_ref, hn_ref, cn_ref,
                            hf_s, cf_s, hb_s, cb_s):
    """One grid step == TT timesteps for BOTH directions.

    gxf_ref : (TT, B, 4U) precomputed input gates, forward time block g.
    gxb_ref : (TT, B, 4U) precomputed input gates, original-time block nb-1-g; the
              backward direction's processing step j reads row TT-1-j of this block.
    whf/whb : (U, 4U) recurrent weights, VMEM-resident (constant index_map).
    outf/outb: (B, TT, U) batch-major output blocks.
    h/c per direction persist across grid steps in VMEM scratch; within a grid step
    they are carried as values through a statically unrolled TT-step loop.
    """
    g = pl.program_id(0)
    ng = pl.num_programs(0)
    tt = gxf_ref.shape[0]
    u = hf_s.shape[-1]

    @pl.when(g == 0)
    def _init():
        hf_s[...] = jnp.zeros_like(hf_s)
        cf_s[...] = jnp.zeros_like(cf_s)
        hb_s[...] = jnp.zeros_like(hb_s)
        cb_s[...] = jnp.zeros_like(cb_s)

    whf = whf_ref[...]
    whb = whb_ref[...]

    def cell(gx, h, c, wh):
        gates = gx + jnp.dot(h.astype(wh.dtype), wh,
                             preferred_element_type=jnp.float32)   # (B, 4U) fused i|f|g|o
        i = jax.nn.sigmoid(gates[:, 0:u])
        f = jax.nn.sigmoid(gates[:, u:2 * u])
        gg = jnp.tanh(gates[:, 2 * u:3 * u])
        o = jax.nn.sigmoid(gates[:, 3 * u:4 * u])
        c_new = f * c + i * gg
        h_new = o * jnp.tanh(c_new)
        return h_new, c_new

    hf, cf = hf_s[...], cf_s[...]
    hb, cb = hb_s[...], cb_s[...]

    # Statically unrolled TT-step loop: h/c live in registers; every step's output is
    # stored straight into the batch-major output block (static slices only).
    for j in range(tt):
        hf, cf = cell(gxf_ref[j].astype(jnp.float32), hf, cf, whf)
        hb, cb = cell(gxb_ref[tt - 1 - j].astype(jnp.float32), hb, cb, whb)
        outf_ref[:, j:j + 1, :] = hf[:, None, :]
        outb_ref[:, tt - 1 - j:tt - j, :] = hb[:, None, :]

    hf_s[...] = hf
    cf_s[...] = cf
    hb_s[...] = hb
    cb_s[...] = cb

    @pl.when(g == ng - 1)
    def _finalize():
        hn_ref[0] = hf
        hn_ref[1] = hb
        cn_ref[0] = cf
        cn_ref[1] = cb


# --------------------------------------------------------------------------- sizing helpers
def _vmem_budget_bytes():
    """~75% of physical VMEM (≈48 MiB on v7x, capped at 100 MiB on v5e/v6e)."""
    try:
        cap = int(pltpu.get_tpu_info().vmem_capacity_bytes)
    except Exception:
        cap = 64 * 1024 * 1024
    return int(min(max(cap * 3 // 4, 16 * 1024 * 1024), 100 * 1024 * 1024))


def _row_tile(total_rows, emb_dim, g4, vmem_budget):
    """Largest row tile (multiple of 8, divisor of total_rows) that fits the VMEM budget."""
    msz = jnp.finfo(MATMUL_DTYPE).bits // 8
    gsz = jnp.finfo(GATE_STORE_DTYPE).bits // 8
    per_row = 2 * (emb_dim * msz + 2 * g4 * gsz)         # double-buffered streaming blocks
    resident = 2 * (2 * emb_dim * g4 * msz + 4 * g4)      # Wx_f/Wx_b (2 bufs) + f32 biases
    cap_rows = max(8, (vmem_budget - resident) // max(per_row, 1))
    target = int(min(total_rows, 2048, cap_rows))
    for d in range(target, 0, -1):
        if total_rows % d == 0 and d % 8 == 0:
            return d
    return total_rows                                     # full block is always layout-legal


def _time_tile(s, max_tt=16):
    """Timesteps per recurrence grid step: multiple of 8 (or the whole sequence)."""
    for d in range(min(s, max_tt), 0, -1):
        if s % d == 0 and d % 8 == 0:
            return d
    return s


# --------------------------------------------------------------------------- wrapper
def encoder_forward(x, embedding_matrix, p):
    """Equivalent of Encoder.forward: returns (enc_output (B,S,2U), (h_n, c_n) each (2,B,U))."""
    b, s = x.shape
    e = embedding_matrix.shape[1]
    u = p['wh_f'].shape[0]
    g4 = 4 * u
    vmem_cap = _vmem_budget_bytes()

    # Cast the MXU operands once (production would keep params stored in bf16).
    emb_tbl = embedding_matrix.astype(MATMUL_DTYPE)
    wx_f = p['wx_f'].astype(MATMUL_DTYPE)
    wx_b = p['wx_b'].astype(MATMUL_DTYPE)
    wh_f = p['wh_f'].astype(MATMUL_DTYPE)
    wh_b = p['wh_b'].astype(MATMUL_DTYPE)

    # Frozen-embedding lookup straight into time-major layout (data-dependent gather
    # stays in JAX glue), then a free reshape to the flat (S*B, E) view.
    emb_t = jnp.take(emb_tbl, jnp.swapaxes(x, 0, 1), axis=0)      # (S, B, E)
    x_flat = emb_t.reshape(s * b, e)                              # (S*B, E)

    # ---- hoisted, fused input->gate projection (all timesteps, both directions) ----
    tr = _row_tile(s * b, e, g4, vmem_cap)
    wspec = pl.BlockSpec((e, g4), lambda i: (0, 0))
    bspec = pl.BlockSpec((1, g4), lambda i: (0, 0))
    gx_f, gx_b = pl.pallas_call(
        inproj_kernel,
        out_shape=(jax.ShapeDtypeStruct((s * b, g4), GATE_STORE_DTYPE),
                   jax.ShapeDtypeStruct((s * b, g4), GATE_STORE_DTYPE)),
        grid=((s * b) // tr,),
        in_specs=[pl.BlockSpec((tr, e), lambda i: (i, 0)),
                  wspec, bspec, wspec, bspec],
        out_specs=(pl.BlockSpec((tr, g4), lambda i: (i, 0)),
                   pl.BlockSpec((tr, g4), lambda i: (i, 0))),
        compiler_params=pltpu.CompilerParams(
            dimension_semantics=("parallel",),
            vmem_limit_bytes=vmem_cap),
    )(x_flat, wx_f, p['b_f'], wx_b, p['b_b'])

    gx_f = gx_f.reshape(s, b, g4)     # free reshapes back to time-major (S, B, 4U)
    gx_b = gx_b.reshape(s, b, g4)

    # ---- single grid-over-time recurrence: TT timesteps / grid step, resident Wh ----
    tt = _time_tile(s)
    nb = s // tt
    whspec = pl.BlockSpec((u, g4), lambda g: (0, 0))
    out_f, out_b, h_n, c_n = pl.pallas_call(
        bilstm_recurrent_kernel,
        out_shape=(jax.ShapeDtypeStruct((b, s, u), jnp.float32),
                   jax.ShapeDtypeStruct((b, s, u), jnp.float32),
                   jax.ShapeDtypeStruct((2, b, u), jnp.float32),
                   jax.ShapeDtypeStruct((2, b, u), jnp.float32)),
        grid=(nb,),
        in_specs=[pl.BlockSpec((tt, b, g4), lambda g: (g, 0, 0)),
                  pl.BlockSpec((tt, b, g4), lambda g: (nb - 1 - g, 0, 0)),
                  whspec, whspec],
        out_specs=(pl.BlockSpec((b, tt, u), lambda g: (0, g, 0)),
                   pl.BlockSpec((b, tt, u), lambda g: (0, nb - 1 - g, 0)),
                   pl.BlockSpec((2, b, u), lambda g: (0, 0, 0)),
                   pl.BlockSpec((2, b, u), lambda g: (0, 0, 0))),
        scratch_shapes=[pltpu.VMEM((b, u), jnp.float32)] * 4,
        compiler_params=pltpu.CompilerParams(
            dimension_semantics=("arbitrary",),
            vmem_limit_bytes=vmem_cap),
    )(gx_f, gx_b, wh_f, wh_b)

    # Outputs are already batch-major; only the cheap feature-dim concat remains.
    enc_out = jnp.concatenate([out_f, out_b], axis=-1)            # (B, S, 2U)
    return enc_out, (h_n, c_n)


def initialize_hidden_state(batch_size, enc_units):
    return jnp.zeros((2, batch_size, enc_units), jnp.float32)


def init_encoder_params(key, emb_dim, units):
    ks = jax.random.split(key, 6)
    s = 0.1

    def nrm(k, shape):
        return jax.random.normal(k, shape, dtype=jnp.float32) * s

    # weights stored as (in_features, 4*units); gate order [i|f|g|o] like torch nn.LSTM
    return {
        'wx_f': nrm(ks[0], (emb_dim, 4 * units)),
        'wh_f': nrm(ks[1], (units, 4 * units)),
        'b_f': nrm(ks[2], (1, 4 * units)),     # = b_ih + b_hh combined
        'wx_b': nrm(ks[3], (emb_dim, 4 * units)),
        'wh_b': nrm(ks[4], (units, 4 * units)),
        'b_b': nrm(ks[5], (1, 4 * units)),
    }


# --------------------------------------------------------------------------- reference
def reference_encoder(x, embedding_matrix, p):
    emb = jnp.take(embedding_matrix, x, axis=0)
    b_sz, _, _ = emb.shape
    u = p['wh_f'].shape[0]
    hp = lax.Precision.HIGHEST

    def cell(xt, h, c, wx, wh, bias):
        g = jnp.dot(xt, wx, precision=hp) + jnp.dot(h, wh, precision=hp) + bias
        i = jax.nn.sigmoid(g[:, :u])
        f = jax.nn.sigmoid(g[:, u:2 * u])
        gg = jnp.tanh(g[:, 2 * u:3 * u])
        o = jax.nn.sigmoid(g[:, 3 * u:])
        c2 = f * c + i * gg
        return o * jnp.tanh(c2), c2

    def run(wx, wh, bias, xs):
        def step(carry, xt):
            h, c = carry
            h2, c2 = cell(xt, h, c, wx, wh, bias)
            return (h2, c2), h2
        init = (jnp.zeros((b_sz, u), jnp.float32), jnp.zeros((b_sz, u), jnp.float32))
        (h_t, c_t), outs = lax.scan(step, init, xs)
        return outs, h_t, c_t

    xs = jnp.swapaxes(emb, 0, 1)
    outs_f, hf, cf = run(p['wx_f'], p['wh_f'], p['b_f'], xs)
    outs_b, hb, cb = run(p['wx_b'], p['wh_b'], p['b_b'], xs[::-1])
    outs_b = outs_b[::-1]
    enc = jnp.swapaxes(jnp.concatenate([outs_f, outs_b], axis=-1), 0, 1)
    return enc, (jnp.stack([hf, hb]), jnp.stack([cf, cb]))


# --------------------------------------------------------------------------- main
if __name__ == "__main__":
    B, S = 2, 8
    VOCAB, EMB, UNITS = 64, 16, 32

    key = jax.random.PRNGKey(0)
    k_emb, k_x, k_p = jax.random.split(key, 3)
    embedding_matrix = jax.random.normal(k_emb, (VOCAB, EMB), jnp.float32) * 0.5
    x = jax.random.randint(k_x, (B, S), 0, VOCAB, dtype=jnp.int32)
    params = init_encoder_params(k_p, EMB, UNITS)

    enc_fn = jax.jit(encoder_forward)
    enc_out, (h_n, c_n) = enc_fn(x, embedding_matrix, params)
    enc_out = jax.block_until_ready(enc_out)
    h_n = jax.block_until_ready(h_n)
    c_n = jax.block_until_ready(c_n)

    assert enc_out.shape == (B, S, 2 * UNITS)
    assert h_n.shape == (2, B, UNITS) and c_n.shape == (2, B, UNITS)
    assert bool(jnp.all(jnp.isfinite(enc_out)))

    ref_out, (ref_h, ref_c) = reference_encoder(x, embedding_matrix, params)
    # bf16 MXU operands + bf16 gx intermediate -> looser tolerance than the pure-f32 path.
    tol = 5e-3 if MATMUL_DTYPE == jnp.float32 else 2e-2
    assert bool(jnp.allclose(enc_out, ref_out, atol=tol, rtol=tol))
    assert bool(jnp.allclose(h_n, ref_h, atol=tol, rtol=tol))
    assert bool(jnp.allclose(c_n, ref_c, atol=tol, rtol=tol))

    print("KERNEL_OK")
</pallas_src>

<mosaic_0001>
module attributes {stable_mosaic.version = 11 : i64} {
  func.func @inproj_kernel(%arg0: i32, %arg1: memref<16x16xbf16, #tpu.memory_space<vmem>>, %arg2: memref<16x128xbf16, #tpu.memory_space<vmem>>, %arg3: memref<1x128xf32, #tpu.memory_space<vmem>>, %arg4: memref<16x128xbf16, #tpu.memory_space<vmem>>, %arg5: memref<1x128xf32, #tpu.memory_space<vmem>>, %arg6: memref<16x128xbf16, #tpu.memory_space<vmem>>, %arg7: memref<16x128xbf16, #tpu.memory_space<vmem>>) attributes {dimension_semantics = [#tpu.dimension_semantics<parallel>], iteration_bounds = array<i64: 1>, scalar_prefetch = 0 : i64, scratch_operands = 0 : i64, tpu.core_type = #tpu.core_type<tc>, window_params = [{transform_indices = @transform_0, window_bounds = array<i64: 16, 16>}, {pipeline_mode = #tpu.pipeline_mode<synchronous>, transform_indices = @transform_1, window_bounds = array<i64: 16, 128>}, {pipeline_mode = #tpu.pipeline_mode<synchronous>, transform_indices = @transform_2, window_bounds = array<i64: 1, 128>}, {pipeline_mode = #tpu.pipeline_mode<synchronous>, transform_indices = @transform_3, window_bounds = array<i64: 16, 128>}, {pipeline_mode = #tpu.pipeline_mode<synchronous>, transform_indices = @transform_4, window_bounds = array<i64: 1, 128>}, {transform_indices = @transform_5, window_bounds = array<i64: 16, 128>}, {transform_indices = @transform_6, window_bounds = array<i64: 16, 128>}]} {
    %c0 = arith.constant 0 : index
    %c0_0 = arith.constant 0 : index
    %0 = vector.load %arg1[%c0, %c0_0] : memref<16x16xbf16, #tpu.memory_space<vmem>>, vector<16x16xbf16>
    %c0_1 = arith.constant 0 : index
    %c0_2 = arith.constant 0 : index
    %1 = vector.load %arg2[%c0_1, %c0_2] : memref<16x128xbf16, #tpu.memory_space<vmem>>, vector<16x128xbf16>
    %cst = arith.constant dense<0.000000e+00> : vector<16x128xf32>
    %2 = tpu.matmul %0, %1, %cst {dimension_numbers = #tpu.dot_dimension_numbers<[1], [0], [0], [1], [0, 0, 1, 1], [], []>} : vector<16x16xbf16>, vector<16x128xbf16>, vector<16x128xf32> -> vector<16x128xf32>
    %c0_3 = arith.constant 0 : index
    %c0_4 = arith.constant 0 : index
    %3 = vector.load %arg3[%c0_3, %c0_4] : memref<1x128xf32, #tpu.memory_space<vmem>>, vector<1x128xf32>
    %4 = vector.broadcast %3 : vector<1x128xf32> to vector<16x128xf32>
    %5 = arith.addf %2, %4 : vector<16x128xf32>
    %c0_5 = arith.constant 0 : index
    %c0_6 = arith.constant 0 : index
    %6 = vector.load %arg4[%c0_5, %c0_6] : memref<16x128xbf16, #tpu.memory_space<vmem>>, vector<16x128xbf16>
    %cst_7 = arith.constant dense<0.000000e+00> : vector<16x128xf32>
    %7 = tpu.matmul %0, %6, %cst_7 {dimension_numbers = #tpu.dot_dimension_numbers<[1], [0], [0], [1], [0, 0, 1, 1], [], []>} : vector<16x16xbf16>, vector<16x128xbf16>, vector<16x128xf32> -> vector<16x128xf32>
    %c0_8 = arith.constant 0 : index
    %c0_9 = arith.constant 0 : index
    %8 = vector.load %arg5[%c0_8, %c0_9] : memref<1x128xf32, #tpu.memory_space<vmem>>, vector<1x128xf32>
    %9 = vector.broadcast %8 : vector<1x128xf32> to vector<16x128xf32>
    %10 = arith.addf %7, %9 : vector<16x128xf32>
    %11 = arith.truncf %5 : vector<16x128xf32> to vector<16x128xbf16>
    %c0_10 = arith.constant 0 : index
    %c0_11 = arith.constant 0 : index
    %12 = vector.load %arg6[%c0_10, %c0_11] : memref<16x128xbf16, #tpu.memory_space<vmem>>, vector<16x128xbf16>
    tpu.vector_store %arg6[%c0_10, %c0_11], %11 {strides = array<i32>} : memref<16x128xbf16, #tpu.memory_space<vmem>>, vector<16x128xbf16>,
    %13 = arith.truncf %10 : vector<16x128xf32> to vector<16x128xbf16>
    %c0_12 = arith.constant 0 : index
    %c0_13 = arith.constant 0 : index
    %14 = vector.load %arg7[%c0_12, %c0_13] : memref<16x128xbf16, #tpu.memory_space<vmem>>, vector<16x128xbf16>
    tpu.vector_store %arg7[%c0_12, %c0_13], %13 {strides = array<i32>} : memref<16x128xbf16, #tpu.memory_space<vmem>>, vector<16x128xbf16>,
    return
  }
  func.func @transform_0(%arg0: i32) -> (i32, i32) {
    %c0_i32 = arith.constant 0 : i32
    %c0_i32_0 = arith.constant 0 : i32
    return %arg0, %c0_i32 : i32, i32
  }
  func.func @transform_1(%arg0: i32) -> (i32, i32) {
    %c0_i32 = arith.constant 0 : i32
    %c0_i32_0 = arith.constant 0 : i32
    %c0_i32_1 = arith.constant 0 : i32
    return %c0_i32, %c0_i32_0 : i32, i32
  }
  func.func @transform_2(%arg0: i32) -> (i32, i32) {
    %c0_i32 = arith.constant 0 : i32
    %c0_i32_0 = arith.constant 0 : i32
    %c0_i32_1 = arith.constant 0 : i32
    return %c0_i32, %c0_i32_0 : i32, i32
  }
  func.func @transform_3(%arg0: i32) -> (i32, i32) {
    %c0_i32 = arith.constant 0 : i32
    %c0_i32_0 = arith.constant 0 : i32
    %c0_i32_1 = arith.constant 0 : i32
    return %c0_i32, %c0_i32_0 : i32, i32
  }
  func.func @transform_4(%arg0: i32) -> (i32, i32) {
    %c0_i32 = arith.constant 0 : i32
    %c0_i32_0 = arith.constant 0 : i32
    %c0_i32_1 = arith.constant 0 : i32
    return %c0_i32, %c0_i32_0 : i32, i32
  }
  func.func @transform_5(%arg0: i32) -> (i32, i32) {
    %c0_i32 = arith.constant 0 : i32
    %c0_i32_0 = arith.constant 0 : i32
    return %arg0, %c0_i32 : i32, i32
  }
  func.func @transform_6(%arg0: i32) -> (i32, i32) {
    %c0_i32 = arith.constant 0 : i32
    %c0_i32_0 = arith.constant 0 : i32
    return %arg0, %c0_i32 : i32, i32
  }
}

module attributes {stable_mosaic.version = 11 : i64} {
  func.func @bilstm_recurrent_kernel(%arg0: i32, %arg1: memref<8x2x128xbf16, #tpu.memory_space<vmem>>, %arg2: memref<8x2x128xbf16, #tpu.memory_space<vmem>>, %arg3: memref<32x128xbf16, #tpu.memory_space<vmem>>, %arg4: memref<32x128xbf16, #tpu.memory_space<vmem>>, %arg5: memref<2x8x32xf32, #tpu.memory_space<vmem>>, %arg6: memref<2x8x32xf32, #tpu.memory_space<vmem>>, %arg7: memref<2x2x32xf32, #tpu.memory_space<vmem>>, %arg8: memref<2x2x32xf32, #tpu.memory_space<vmem>>, %arg9: memref<2x32xf32, #tpu.memory_space<vmem>>, %arg10: memref<2x32xf32, #tpu.memory_space<vmem>>, %arg11: memref<2x32xf32, #tpu.memory_space<vmem>>, %arg12: memref<2x32xf32, #tpu.memory_space<vmem>>) attributes {dimension_semantics = [#tpu.dimension_semantics<arbitrary>], iteration_bounds = array<i64: 1>, scalar_prefetch = 0 : i64, scratch_operands = 4 : i64, tpu.core_type = #tpu.core_type<tc>, window_params = [{transform_indices = @transform_0, window_bounds = array<i64: 8, 2, 128>}, {transform_indices = @transform_1, window_bounds = array<i64: 8, 2, 128>}, {pipeline_mode = #tpu.pipeline_mode<synchronous>, transform_indices = @transform_2, window_bounds = array<i64: 32, 128>}, {pipeline_mode = #tpu.pipeline_mode<synchronous>, transform_indices = @transform_3, window_bounds = array<i64: 32, 128>}, {transform_indices = @transform_4, window_bounds = array<i64: 2, 8, 32>}, {transform_indices = @transform_5, window_bounds = array<i64: 2, 8, 32>}, {pipeline_mode = #tpu.pipeline_mode<synchronous>, transform_indices = @transform_6, window_bounds = array<i64: 2, 2, 32>}, {pipeline_mode = #tpu.pipeline_mode<synchronous>, transform_indices = @transform_7, window_bounds = array<i64: 2, 2, 32>}]} {
    %c0_i32 = arith.constant 0 : i32
    %0 = arith.cmpi eq, %arg0, %c0_i32 : i32
    %1 = arith.extui %0 : i1 to i32
    %c0_i32_0 = arith.constant 0 : i32
    %2 = arith.cmpi ne, %1, %c0_i32_0 : i32
    scf.if %2 {
      %cst_174 = arith.constant 0.000000e+00 : f32
      %544 = vector.broadcast %cst_174 : f32 to vector<2x32xf32>
      %c0_175 = arith.constant 0 : index
      %c0_176 = arith.constant 0 : index
      %545 = vector.load %arg9[%c0_175, %c0_176] : memref<2x32xf32, #tpu.memory_space<vmem>>, vector<2x32xf32>
      tpu.vector_store %arg9[%c0_175, %c0_176], %544 {strides = array<i32>} : memref<2x32xf32, #tpu.memory_space<vmem>>, vector<2x32xf32>,
      %cst_177 = arith.constant 0.000000e+00 : f32
      %546 = vector.broadcast %cst_177 : f32 to vector<2x32xf32>
      %c0_178 = arith.constant 0 : index
      %c0_179 = arith.constant 0 : index
      %547 = vector.load %arg10[%c0_178, %c0_179] : memref<2x32xf32, #tpu.memory_space<vmem>>, vector<2x32xf32>
      tpu.vector_store %arg10[%c0_178, %c0_179], %546 {strides = array<i32>} : memref<2x32xf32, #tpu.memory_space<vmem>>, vector<2x32xf32>,
      %cst_180 = arith.constant 0.000000e+00 : f32
      %548 = vector.broadcast %cst_180 : f32 to vector<2x32xf32>
      %c0_181 = arith.constant 0 : index
      %c0_182 = arith.constant 0 : index
      %549 = vector.load %arg11[%c0_181, %c0_182] : memref<2x32xf32, #tpu.memory_space<vmem>>, vector<2x32xf32>
      tpu.vector_store %arg11[%c0_181, %c0_182], %548 {strides = array<i32>} : memref<2x32xf32, #tpu.memory_space<vmem>>, vector<2x32xf32>,
      %cst_183 = arith.constant 0.000000e+00 : f32
      %550 = vector.broadcast %cst_183 : f32 to vector<2x32xf32>
      %c0_184 = arith.constant 0 : index
      %c0_185 = arith.constant 0 : index
      %551 = vector.load %arg12[%c0_184, %c0_185] : memref<2x32xf32, #tpu.memory_space<vmem>>, vector<2x32xf32>
      tpu.vector_store %arg12[%c0_184, %c0_185], %550 {strides = array<i32>} : memref<2x32xf32, #tpu.memory_space<vmem>>, vector<2x32xf32>,
    } else {
    }
    %c0 = arith.constant 0 : index
    %c0_1 = arith.constant 0 : index
    %3 = vector.load %arg3[%c0, %c0_1] : memref<32x128xbf16, #tpu.memory_space<vmem>>, vector<32x128xbf16>
    %c0_2 = arith.constant 0 : index
    %c0_3 = arith.constant 0 : index
    %4 = vector.load %arg4[%c0_2, %c0_3] : memref<32x128xbf16, #tpu.memory_space<vmem>>, vector<32x128xbf16>
    %c0_4 = arith.constant 0 : index
    %c0_5 = arith.constant 0 : index
    %5 = vector.load %arg9[%c0_4, %c0_5] : memref<2x32xf32, #tpu.memory_space<vmem>>, vector<2x32xf32>
    %c0_6 = arith.constant 0 : index
    %c0_7 = arith.constant 0 : index
    %6 = vector.load %arg10[%c0_6, %c0_7] : memref<2x32xf32, #tpu.memory_space<vmem>>, vector<2x32xf32>
    %c0_8 = arith.constant 0 : index
    %c0_9 = arith.constant 0 : index
    %7 = vector.load %arg11[%c0_8, %c0_9] : memref<2x32xf32, #tpu.memory_space<vmem>>, vector<2x32xf32>
    %c0_10 = arith.constant 0 : index
    %c0_11 = arith.constant 0 : index
    %8 = vector.load %arg12[%c0_10, %c0_11] : memref<2x32xf32, #tpu.memory_space<vmem>>, vector<2x32xf32>
    %c0_12 = arith.constant 0 : index
    %c0_13 = arith.constant 0 : index
    %c0_14 = arith.constant 0 : index
    %9 = vector.load %arg1[%c0_12, %c0_13, %c0_14] : memref<8x2x128xbf16, #tpu.memory_space<vmem>>, vector<1x2x128xbf16>
    %10 = vector.shape_cast %9 : vector<1x2x128xbf16> to vector<2x128xbf16>
    %11 = arith.extf %10 : vector<2x128xbf16> to vector<2x128xf32>
    %12 = arith.truncf %5 : vector<2x32xf32> to vector<2x32xbf16>
    %cst = arith.constant dense<0.000000e+00> : vector<2x128xf32>
    %13 = tpu.matmul %12, %3, %cst {dimension_numbers = #tpu.dot_dimension_numbers<[1], [0], [0], [1], [0, 0, 1, 1], [], []>} : vector<2x32xbf16>, vector<32x128xbf16>, vector<2x128xf32> -> vector<2x128xf32>
    %14 = arith.addf %11, %13 : vector<2x128xf32>
    %15 = vector.extract_strided_slice %14 {offsets = [0, 0], sizes = [2, 32], strides = [1, 1]} : vector<2x128xf32> to vector<2x32xf32>
    %16 = arith.negf %15 : vector<2x32xf32>
    %17 = math.exp %16 : vector<2x32xf32>
    %cst_15 = arith.constant 1.000000e+00 : f32
    %18 = vector.broadcast %cst_15 : f32 to vector<2x32xf32>
    %19 = arith.addf %18, %17 : vector<2x32xf32>
    %20 = arith.divf %18, %19 : vector<2x32xf32>
    %21 = vector.extract_strided_slice %14 {offsets = [0, 32], sizes = [2, 32], strides = [1, 1]} : vector<2x128xf32> to vector<2x32xf32>
    %22 = arith.negf %21 : vector<2x32xf32>
    %23 = math.exp %22 : vector<2x32xf32>
    %cst_16 = arith.constant 1.000000e+00 : f32
    %24 = vector.broadcast %cst_16 : f32 to vector<2x32xf32>
    %25 = arith.addf %24, %23 : vector<2x32xf32>
    %26 = arith.divf %24, %25 : vector<2x32xf32>
    %27 = vector.extract_strided_slice %14 {offsets = [0, 64], sizes = [2, 32], strides = [1, 1]} : vector<2x128xf32> to vector<2x32xf32>
    %28 = math.tanh %27 : vector<2x32xf32>
    %29 = vector.extract_strided_slice %14 {offsets = [0, 96], sizes = [2, 32], strides = [1, 1]} : vector<2x128xf32> to vector<2x32xf32>
    %30 = arith.negf %29 : vector<2x32xf32>
    %31 = math.exp %30 : vector<2x32xf32>
    %cst_17 = arith.constant 1.000000e+00 : f32
    %32 = vector.broadcast %cst_17 : f32 to vector<2x32xf32>
    %33 = arith.addf %32, %31 : vector<2x32xf32>
    %34 = arith.divf %32, %33 : vector<2x32xf32>
    %35 = arith.mulf %26, %6 : vector<2x32xf32>
    %36 = arith.mulf %20, %28 : vector<2x32xf32>
    %37 = arith.addf %35, %36 : vector<2x32xf32>
    %38 = math.tanh %37 : vector<2x32xf32>
    %39 = arith.mulf %34, %38 : vector<2x32xf32>
    %c7 = arith.constant 7 : index
    %c0_18 = arith.constant 0 : index
    %c0_19 = arith.constant 0 : index
    %40 = vector.load %arg2[%c7, %c0_18, %c0_19] : memref<8x2x128xbf16, #tpu.memory_space<vmem>>, vector<1x2x128xbf16>
    %41 = vector.shape_cast %40 : vector<1x2x128xbf16> to vector<2x128xbf16>
    %42 = arith.extf %41 : vector<2x128xbf16> to vector<2x128xf32>
    %43 = arith.truncf %7 : vector<2x32xf32> to vector<2x32xbf16>
    %cst_20 = arith.constant dense<0.000000e+00> : vector<2x128xf32>
    %44 = tpu.matmul %43, %4, %cst_20 {dimension_numbers = #tpu.dot_dimension_numbers<[1], [0], [0], [1], [0, 0, 1, 1], [], []>} : vector<2x32xbf16>, vector<32x128xbf16>, vector<2x128xf32> -> vector<2x128xf32>
    %45 = arith.addf %42, %44 : vector<2x128xf32>
    %46 = vector.extract_strided_slice %45 {offsets = [0, 0], sizes = [2, 32], strides = [1, 1]} : vector<2x128xf32> to vector<2x32xf32>
    %47 = arith.negf %46 : vector<2x32xf32>
    %48 = math.exp %47 : vector<2x32xf32>
    %cst_21 = arith.constant 1.000000e+00 : f32
    %49 = vector.broadcast %cst_21 : f32 to vector<2x32xf32>
    %50 = arith.addf %49, %48 : vector<2x32xf32>
    %51 = arith.divf %49, %50 : vector<2x32xf32>
    %52 = vector.extract_strided_slice %45 {offsets = [0, 32], sizes = [2, 32], strides = [1, 1]} : vector<2x128xf32> to vector<2x32xf32>
    %53 = arith.negf %52 : vector<2x32xf32>
    %54 = math.exp %53 : vector<2x32xf32>
    %cst_22 = arith.constant 1.000000e+00 : f32
    %55 = vector.broadcast %cst_22 : f32 to vector<2x32xf32>
    %56 = arith.addf %55, %54 : vector<2x32xf32>
    %57 = arith.divf %55, %56 : vector<2x32xf32>
    %58 = vector.extract_strided_slice %45 {offsets = [0, 64], sizes = [2, 32], strides = [1, 1]} : vector<2x128xf32> to vector<2x32xf32>
    %59 = math.tanh %58 : vector<2x32xf32>
    %60 = vector.extract_strided_slice %45 {offsets = [0, 96], sizes = [2, 32], strides = [1, 1]} : vector<2x128xf32> to vector<2x32xf32>
    %61 = arith.negf %60 : vector<2x32xf32>
    %62 = math.exp %61 : vector<2x32xf32>
    %cst_23 = arith.constant 1.000000e+00 : f32
    %63 = vector.broadcast %cst_23 : f32 to vector<2x32xf32>
    %64 = arith.addf %63, %62 : vector<2x32xf32>
    %65 = arith.divf %63, %64 : vector<2x32xf32>
    %66 = arith.mulf %57, %8 : vector<2x32xf32>
    %67 = arith.mulf %51, %59 : vector<2x32xf32>
    %68 = arith.addf %66, %67 : vector<2x32xf32>
    %69 = math.tanh %68 : vector<2x32xf32>
    %70 = arith.mulf %65, %69 : vector<2x32xf32>
    %71 = vector.shape_cast %39 : vector<2x32xf32> to vector<2x1x32xf32>
    %c0_24 = arith.constant 0 : index
    %c0_25 = arith.constant 0 : index
    %c0_26 = arith.constant 0 : index
    %72 = vector.load %arg5[%c0_24, %c0_25, %c0_26] : memref<2x8x32xf32, #tpu.memory_space<vmem>>, vector<2x1x32xf32>
    tpu.vector_store %arg5[%c0_24, %c0_25, %c0_26], %71 {strides = array<i32>} : memref<2x8x32xf32, #tpu.memory_space<vmem>>, vector<2x1x32xf32>,
    %73 = vector.shape_cast %70 : vector<2x32xf32> to vector<2x1x32xf32>
    %c0_27 = arith.constant 0 : index
    %c7_28 = arith.constant 7 : index
    %c0_29 = arith.constant 0 : index
    %74 = vector.load %arg6[%c0_27, %c7_28, %c0_29] : memref<2x8x32xf32, #tpu.memory_space<vmem>>, vector<2x1x32xf32>
    tpu.vector_store %arg6[%c0_27, %c7_28, %c0_29], %73 {strides = array<i32>} : memref<2x8x32xf32, #tpu.memory_space<vmem>>, vector<2x1x32xf32>,
    %c1 = arith.constant 1 : index
    %c0_30 = arith.constant 0 : index
    %c0_31 = arith.constant 0 : index
    %75 = vector.load %arg1[%c1, %c0_30, %c0_31] : memref<8x2x128xbf16, #tpu.memory_space<vmem>>, vector<1x2x128xbf16>
    %76 = vector.shape_cast %75 : vector<1x2x128xbf16> to vector<2x128xbf16>
    %77 = arith.extf %76 : vector<2x128xbf16> to vector<2x128xf32>
    %78 = arith.truncf %39 : vector<2x32xf32> to vector<2x32xbf16>
    %cst_32 = arith.constant dense<0.000000e+00> : vector<2x128xf32>
    %79 = tpu.matmul %78, %3, %cst_32 {dimension_numbers = #tpu.dot_dimension_numbers<[1], [0], [0], [1], [0, 0, 1, 1], [], []>} : vector<2x32xbf16>, vector<32x128xbf16>, vector<2x128xf32> -> vector<2x128xf32>
    %80 = arith.addf %77, %79 : vector<2x128xf32>
    %81 = vector.extract_strided_slice %80 {offsets = [0, 0], sizes = [2, 32], strides = [1, 1]} : vector<2x128xf32> to vector<2x32xf32>
    %82 = arith.negf %81 : vector<2x32xf32>
    %83 = math.exp %82 : vector<2x32xf32>
    %cst_33 = arith.constant 1.000000e+00 : f32
    %84 = vector.broadcast %cst_33 : f32 to vector<2x32xf32>
    %85 = arith.addf %84, %83 : vector<2x32xf32>
    %86 = arith.divf %84, %85 : vector<2x32xf32>
    %87 = vector.extract_strided_slice %80 {offsets = [0, 32], sizes = [2, 32], strides = [1, 1]} : vector<2x128xf32> to vector<2x32xf32>
    %88 = arith.negf %87 : vector<2x32xf32>
    %89 = math.exp %88 : vector<2x32xf32>
    %cst_34 = arith.constant 1.000000e+00 : f32
    %90 = vector.broadcast %cst_34 : f32 to vector<2x32xf32>
    %91 = arith.addf %90, %89 : vector<2x32xf32>
    %92 = arith.divf %90, %91 : vector<2x32xf32>
    %93 = vector.extract_strided_slice %80 {offsets = [0, 64], sizes = [2, 32], strides = [1, 1]} : vector<2x128xf32> to vector<2x32xf32>
    %94 = math.tanh %93 : vector<2x32xf32>
    %95 = vector.extract_strided_slice %80 {offsets = [0, 96], sizes = [2, 32], strides = [1, 1]} : vector<2x128xf32> to vector<2x32xf32>
    %96 = arith.negf %95 : vector<2x32xf32>
    %97 = math.exp %96 : vector<2x32xf32>
    %cst_35 = arith.constant 1.000000e+00 : f32
    %98 = vector.broadcast %cst_35 : f32 to vector<2x32xf32>
    %99 = arith.addf %98, %97 : vector<2x32xf32>
    %100 = arith.divf %98, %99 : vector<2x32xf32>
    %101 = arith.mulf %92, %37 : vector<2x32xf32>
    %102 = arith.mulf %86, %94 : vector<2x32xf32>
    %103 = arith.addf %101, %102 : vector<2x32xf32>
    %104 = math.tanh %103 : vector<2x32xf32>
    %105 = arith.mulf %100, %104 : vector<2x32xf32>
    %c6 = arith.constant 6 : index
    %c0_36 = arith.constant 0 : index
    %c0_37 = arith.constant 0 : index
    %106 = vector.load %arg2[%c6, %c0_36, %c0_37] : memref<8x2x128xbf16, #tpu.memory_space<vmem>>, vector<1x2x128xbf16>
    %107 = vector.shape_cast %106 : vector<1x2x128xbf16> to vector<2x128xbf16>
    %108 = arith.extf %107 : vector<2x128xbf16> to vector<2x128xf32>
    %109 = arith.truncf %70 : vector<2x32xf32> to vector<2x32xbf16>
    %cst_38 = arith.constant dense<0.000000e+00> : vector<2x128xf32>
    %110 = tpu.matmul %109, %4, %cst_38 {dimension_numbers = #tpu.dot_dimension_numbers<[1], [0], [0], [1], [0, 0, 1, 1], [], []>} : vector<2x32xbf16>, vector<32x128xbf16>, vector<2x128xf32> -> vector<2x128xf32>
    %111 = arith.addf %108, %110 : vector<2x128xf32>
    %112 = vector.extract_strided_slice %111 {offsets = [0, 0], sizes = [2, 32], strides = [1, 1]} : vector<2x128xf32> to vector<2x32xf32>
    %113 = arith.negf %112 : vector<2x32xf32>
    %114 = math.exp %113 : vector<2x32xf32>
    %cst_39 = arith.constant 1.000000e+00 : f32
    %115 = vector.broadcast %cst_39 : f32 to vector<2x32xf32>
    %116 = arith.addf %115, %114 : vector<2x32xf32>
    %117 = arith.divf %115, %116 : vector<2x32xf32>
    %118 = vector.extract_strided_slice %111 {offsets = [0, 32], sizes = [2, 32], strides = [1, 1]} : vector<2x128xf32> to vector<2x32xf32>
    %119 = arith.negf %118 : vector<2x32xf32>
    %120 = math.exp %119 : vector<2x32xf32>
    %cst_40 = arith.constant 1.000000e+00 : f32
    %121 = vector.broadcast %cst_40 : f32 to vector<2x32xf32>
    %122 = arith.addf %121, %120 : vector<2x32xf32>
    %123 = arith.divf %121, %122 : vector<2x32xf32>
    %124 = vector.extract_strided_slice %111 {offsets = [0, 64], sizes = [2, 32], strides = [1, 1]} : vector<2x128xf32> to vector<2x32xf32>
    %125 = math.tanh %124 : vector<2x32xf32>
    %126 = vector.extract_strided_slice %111 {offsets = [0, 96], sizes = [2, 32], strides = [1, 1]} : vector<2x128xf32> to vector<2x32xf32>
    %127 = arith.negf %126 : vector<2x32xf32>
    %128 = math.exp %127 : vector<2x32xf32>
    %cst_41 = arith.constant 1.000000e+00 : f32
    %129 = vector.broadcast %cst_41 : f32 to vector<2x32xf32>
    %130 = arith.addf %129, %128 : vector<2x32xf32>
    %131 = arith.divf %129, %130 : vector<2x32xf32>
    %132 = arith.mulf %123, %68 : vector<2x32xf32>
    %133 = arith.mulf %117, %125 : vector<2x32xf32>
    %134 = arith.addf %132, %133 : vector<2x32xf32>
    %135 = math.tanh %134 : vector<2x32xf32>
    %136 = arith.mulf %131, %135 : vector<2x32xf32>
    %137 = vector.shape_cast %105 : vector<2x32xf32> to vector<2x1x32xf32>
    %c0_42 = arith.constant 0 : index
    %c1_43 = arith.constant 1 : index
    %c0_44 = arith.constant 0 : index
    %138 = vector.load %arg5[%c0_42, %c1_43, %c0_44] : memref<2x8x32xf32, #tpu.memory_space<vmem>>, vector<2x1x32xf32>
    tpu.vector_store %arg5[%c0_42, %c1_43, %c0_44], %137 {strides = array<i32>} : memref<2x8x32xf32, #tpu.memory_space<vmem>>, vector<2x1x32xf32>,
    %139 = vector.shape_cast %136 : vector<2x32xf32> to vector<2x1x32xf32>
    %c0_45 = arith.constant 0 : index
    %c6_46 = arith.constant 6 : index
    %c0_47 = arith.constant 0 : index
    %140 = vector.load %arg6[%c0_45, %c6_46, %c0_47] : memref<2x8x32xf32, #tpu.memory_space<vmem>>, vector<2x1x32xf32>
    tpu.vector_store %arg6[%c0_45, %c6_46, %c0_47], %139 {strides = array<i32>} : memref<2x8x32xf32, #tpu.memory_space<vmem>>, vector<2x1x32xf32>,
    %c2 = arith.constant 2 : index
    %c0_48 = arith.constant 0 : index
    %c0_49 = arith.constant 0 : index
    %141 = vector.load %arg1[%c2, %c0_48, %c0_49] : memref<8x2x128xbf16, #tpu.memory_space<vmem>>, vector<1x2x128xbf16>
    %142 = vector.shape_cast %141 : vector<1x2x128xbf16> to vector<2x128xbf16>
    %143 = arith.extf %142 : vector<2x128xbf16> to vector<2x128xf32>
    %144 = arith.truncf %105 : vector<2x32xf32> to vector<2x32xbf16>
    %cst_50 = arith.constant dense<0.000000e+00> : vector<2x128xf32>
    %145 = tpu.matmul %144, %3, %cst_50 {dimension_numbers = #tpu.dot_dimension_numbers<[1], [0], [0], [1], [0, 0, 1, 1], [], []>} : vector<2x32xbf16>, vector<32x128xbf16>, vector<2x128xf32> -> vector<2x128xf32>
    %146 = arith.addf %143, %145 : vector<2x128xf32>
    %147 = vector.extract_strided_slice %146 {offsets = [0, 0], sizes = [2, 32], strides = [1, 1]} : vector<2x128xf32> to vector<2x32xf32>
    %148 = arith.negf %147 : vector<2x32xf32>
    %149 = math.exp %148 : vector<2x32xf32>
    %cst_51 = arith.constant 1.000000e+00 : f32
    %150 = vector.broadcast %cst_51 : f32 to vector<2x32xf32>
    %151 = arith.addf %150, %149 : vector<2x32xf32>
    %152 = arith.divf %150, %151 : vector<2x32xf32>
    %153 = vector.extract_strided_slice %146 {offsets = [0, 32], sizes = [2, 32], strides = [1, 1]} : vector<2x128xf32> to vector<2x32xf32>
    %154 = arith.negf %153 : vector<2x32xf32>
    %155 = math.exp %154 : vector<2x32xf32>
    %cst_52 = arith.constant 1.000000e+00 : f32
    %156 = vector.broadcast %cst_52 : f32 to vector<2x32xf32>
    %157 = arith.addf %156, %155 : vector<2x32xf32>
    %158 = arith.divf %156, %157 : vector<2x32xf32>
    %159 = vector.extract_strided_slice %146 {offsets = [0, 64], sizes = [2, 32], strides = [1, 1]} : vector<2x128xf32> to vector<2x32xf32>
    %160 = math.tanh %159 : vector<2x32xf32>
    %161 = vector.extract_strided_slice %146 {offsets = [0, 96], sizes = [2, 32], strides = [1, 1]} : vector<2x128xf32> to vector<2x32xf32>
    %162 = arith.negf %161 : vector<2x32xf32>
    %163 = math.exp %162 : vector<2x32xf32>
    %cst_53 = arith.constant 1.000000e+00 : f32
    %164 = vector.broadcast %cst_53 : f32 to vector<2x32xf32>
    %165 = arith.addf %164, %163 : vector<2x32xf32>
    %166 = arith.divf %164, %165 : vector<2x32xf32>
    %167 = arith.mulf %158, %103 : vector<2x32xf32>
    %168 = arith.mulf %152, %160 : vector<2x32xf32>
    %169 = arith.addf %167, %168 : vector<2x32xf32>
    %170 = math.tanh %169 : vector<2x32xf32>
    %171 = arith.mulf %166, %170 : vector<2x32xf32>
    %c5 = arith.constant 5 : index
    %c0_54 = arith.constant 0 : index
    %c0_55 = arith.constant 0 : index
    %172 = vector.load %arg2[%c5, %c0_54, %c0_55] : memref<8x2x128xbf16, #tpu.memory_space<vmem>>, vector<1x2x128xbf16>
    %173 = vector.shape_cast %172 : vector<1x2x128xbf16> to vector<2x128xbf16>
    %174 = arith.extf %173 : vector<2x128xbf16> to vector<2x128xf32>
    %175 = arith.truncf %136 : vector<2x32xf32> to vector<2x32xbf16>
    %cst_56 = arith.constant dense<0.000000e+00> : vector<2x128xf32>
    %176 = tpu.matmul %175, %4, %cst_56 {dimension_numbers = #tpu.dot_dimension_numbers<[1], [0], [0], [1], [0, 0, 1, 1], [], []>} : vector<2x32xbf16>, vector<32x128xbf16>, vector<2x128xf32> -> vector<2x128xf32>
    %177 = arith.addf %174, %176 : vector<2x128xf32>
    %178 = vector.extract_strided_slice %177 {offsets = [0, 0], sizes = [2, 32], strides = [1, 1]} : vector<2x128xf32> to vector<2x32xf32>
    %179 = arith.negf %178 : vector<2x32xf32>
    %180 = math.exp %179 : vector<2x32xf32>
    %cst_57 = arith.constant 1.000000e+00 : f32
    %181 = vector.broadcast %cst_57 : f32 to vector<2x32xf32>
    %182 = arith.addf %181, %180 : vector<2x32xf32>
    %183 = arith.divf %181, %182 : vector<2x32xf32>
    %184 = vector.extract_strided_slice %177 {offsets = [0, 32], sizes = [2, 32], strides = [1, 1]} : vector<2x128xf32> to vector<2x32xf32>
    %185 = arith.negf %184 : vector<2x32xf32>
    %186 = math.exp %185 : vector<2x32xf32>
    %cst_58 = arith.constant 1.000000e+00 : f32
    %187 = vector.broadcast %cst_58 : f32 to vector<2x32xf32>
    %188 = arith.addf %187, %186 : vector<2x32xf32>
    %189 = arith.divf %187, %188 : vector<2x32xf32>
    %190 = vector.extract_strided_slice %177 {offsets = [0, 64], sizes = [2, 32], strides = [1, 1]} : vector<2x128xf32> to vector<2x32xf32>
    %191 = math.tanh %190 : vector<2x32xf32>
    %192 = vector.extract_strided_slice %177 {offsets = [0, 96], sizes = [2, 32], strides = [1, 1]} : vector<2x128xf32> to vector<2x32xf32>
    %193 = arith.negf %192 : vector<2x32xf32>
    %194 = math.exp %193 : vector<2x32xf32>
    %cst_59 = arith.constant 1.000000e+00 : f32
    %195 = vector.broadcast %cst_59 : f32 to vector<2x32xf32>
    %196 = arith.addf %195, %194 : vector<2x32xf32>
    %197 = arith.divf %195, %196 : vector<2x32xf32>
    %198 = arith.mulf %189, %134 : vector<2x32xf32>
    %199 = arith.mulf %183, %191 : vector<2x32xf32>
    %200 = arith.addf %198, %199 : vector<2x32xf32>
    %201 = math.tanh %200 : vector<2x32xf32>
    %202 = arith.mulf %197, %201 : vector<2x32xf32>
    %203 = vector.shape_cast %171 : vector<2x32xf32> to vector<2x1x32xf32>
    %c0_60 = arith.constant 0 : index
    %c2_61 = arith.constant 2 : index
    %c0_62 = arith.constant 0 : index
    %204 = vector.load %arg5[%c0_60, %c2_61, %c0_62] : memref<2x8x32xf32, #tpu.memory_space<vmem>>, vector<2x1x32xf32>
    tpu.vector_store %arg5[%c0_60, %c2_61, %c0_62], %203 {strides = array<i32>} : memref<2x8x32xf32, #tpu.memory_space<vmem>>, vector<2x1x32xf32>,
    %205 = vector.shape_cast %202 : vector<2x32xf32> to vector<2x1x32xf32>
    %c0_63 = arith.constant 0 : index
    %c5_64 = arith.constant 5 : index
    %c0_65 = arith.constant 0 : index
    %206 = vector.load %arg6[%c0_63, %c5_64, %c0_65] : memref<2x8x32xf32, #tpu.memory_space<vmem>>, vector<2x1x32xf32>
    tpu.vector_store %arg6[%c0_63, %c5_64, %c0_65], %205 {strides = array<i32>} : memref<2x8x32xf32, #tpu.memory_space<vmem>>, vector<2x1x32xf32>,
    %c3 = arith.constant 3 : index
    %c0_66 = arith.constant 0 : index
    %c0_67 = arith.constant 0 : index
    %207 = vector.load %arg1[%c3, %c0_66, %c0_67] : memref<8x2x128xbf16, #tpu.memory_space<vmem>>, vector<1x2x128xbf16>
    %208 = vector.shape_cast %207 : vector<1x2x128xbf16> to vector<2x128xbf16>
    %209 = arith.extf %208 : vector<2x128xbf16> to vector<2x128xf32>
    %210 = arith.truncf %171 : vector<2x32xf32> to vector<2x32xbf16>
    %cst_68 = arith.constant dense<0.000000e+00> : vector<2x128xf32>
    %211 = tpu.matmul %210, %3, %cst_68 {dimension_numbers = #tpu.dot_dimension_numbers<[1], [0], [0], [1], [0, 0, 1, 1], [], []>} : vector<2x32xbf16>, vector<32x128xbf16>, vector<2x128xf32> -> vector<2x128xf32>
    %212 = arith.addf %209, %211 : vector<2x128xf32>
    %213 = vector.extract_strided_slice %212 {offsets = [0, 0], sizes = [2, 32], strides = [1, 1]} : vector<2x128xf32> to vector<2x32xf32>
    %214 = arith.negf %213 : vector<2x32xf32>
    %215 = math.exp %214 : vector<2x32xf32>
    %cst_69 = arith.constant 1.000000e+00 : f32
    %216 = vector.broadcast %cst_69 : f32 to vector<2x32xf32>
    %217 = arith.addf %216, %215 : vector<2x32xf32>
    %218 = arith.divf %216, %217 : vector<2x32xf32>
    %219 = vector.extract_strided_slice %212 {offsets = [0, 32], sizes = [2, 32], strides = [1, 1]} : vector<2x128xf32> to vector<2x32xf32>
    %220 = arith.negf %219 : vector<2x32xf32>
    %221 = math.exp %220 : vector<2x32xf32>
    %cst_70 = arith.constant 1.000000e+00 : f32
    %222 = vector.broadcast %cst_70 : f32 to vector<2x32xf32>
    %223 = arith.addf %222, %221 : vector<2x32xf32>
    %224 = arith.divf %222, %223 : vector<2x32xf32>
    %225 = vector.extract_strided_slice %212 {offsets = [0, 64], sizes = [2, 32], strides = [1, 1]} : vector<2x128xf32> to vector<2x32xf32>
    %226 = math.tanh %225 : vector<2x32xf32>
    %227 = vector.extract_strided_slice %212 {offsets = [0, 96], sizes = [2, 32], strides = [1, 1]} : vector<2x128xf32> to vector<2x32xf32>
    %228 = arith.negf %227 : vector<2x32xf32>
    %229 = math.exp %228 : vector<2x32xf32>
    %cst_71 = arith.constant 1.000000e+00 : f32
    %230 = vector.broadcast %cst_71 : f32 to vector<2x32xf32>
    %231 = arith.addf %230, %229 : vector<2x32xf32>
    %232 = arith.divf %230, %231 : vector<2x32xf32>
    %233 = arith.mulf %224, %169 : vector<2x32xf32>
    %234 = arith.mulf %218, %226 : vector<2x32xf32>
    %235 = arith.addf %233, %234 : vector<2x32xf32>
    %236 = math.tanh %235 : vector<2x32xf32>
    %237 = arith.mulf %232, %236 : vector<2x32xf32>
    %c4 = arith.constant 4 : index
    %c0_72 = arith.constant 0 : index
    %c0_73 = arith.constant 0 : index
    %238 = vector.load %arg2[%c4, %c0_72, %c0_73] : memref<8x2x128xbf16, #tpu.memory_space<vmem>>, vector<1x2x128xbf16>
    %239 = vector.shape_cast %238 : vector<1x2x128xbf16> to vector<2x128xbf16>
    %240 = arith.extf %239 : vector<2x128xbf16> to vector<2x128xf32>
    %241 = arith.truncf %202 : vector<2x32xf32> to vector<2x32xbf16>
    %cst_74 = arith.constant dense<0.000000e+00> : vector<2x128xf32>
    %242 = tpu.matmul %241, %4, %cst_74 {dimension_numbers = #tpu.dot_dimension_numbers<[1], [0], [0], [1], [0, 0, 1, 1], [], []>} : vector<2x32xbf16>, vector<32x128xbf16>, vector<2x128xf32> -> vector<2x128xf32>
    %243 = arith.addf %240, %242 : vector<2x128xf32>
    %244 = vector.extract_strided_slice %243 {offsets = [0, 0], sizes = [2, 32], strides = [1, 1]} : vector<2x128xf32> to vector<2x32xf32>
    %245 = arith.negf %244 : vector<2x32xf32>
    %246 = math.exp %245 : vector<2x32xf32>
    %cst_75 = arith.constant 1.000000e+00 : f32
    %247 = vector.broadcast %cst_75 : f32 to vector<2x32xf32>
    %248 = arith.addf %247, %246 : vector<2x32xf32>
    %249 = arith.divf %247, %248 : vector<2x32xf32>
    %250 = vector.extract_strided_slice %243 {offsets = [0, 32], sizes = [2, 32], strides = [1, 1]} : vector<2x128xf32> to vector<2x32xf32>
    %251 = arith.negf %250 : vector<2x32xf32>
    %252 = math.exp %251 : vector<2x32xf32>
    %cst_76 = arith.constant 1.000000e+00 : f32
    %253 = vector.broadcast %cst_76 : f32 to vector<2x32xf32>
    %254 = arith.addf %253, %252 : vector<2x32xf32>
    %255 = arith.divf %253, %254 : vector<2x32xf32>
    %256 = vector.extract_strided_slice %243 {offsets = [0, 64], sizes = [2, 32], strides = [1, 1]} : vector<2x128xf32> to vector<2x32xf32>
    %257 = math.tanh %256 : vector<2x32xf32>
    %258 = vector.extract_strided_slice %243 {offsets = [0, 96], sizes = [2, 32], strides = [1, 1]} : vector<2x128xf32> to vector<2x32xf32>
    %259 = arith.negf %258 : vector<2x32xf32>
    %260 = math.exp %259 : vector<2x32xf32>
    %cst_77 = arith.constant 1.000000e+00 : f32
    %261 = vector.broadcast %cst_77 : f32 to vector<2x32xf32>
    %262 = arith.addf %261, %260 : vector<2x32xf32>
    %263 = arith.divf %261, %262 : vector<2x32xf32>
    %264 = arith.mulf %255, %200 : vector<2x32xf32>
    %265 = arith.mulf %249, %257 : vector<2x32xf32>
    %266 = arith.addf %264, %265 : vector<2x32xf32>
    %267 = math.tanh %266 : vector<2x32xf32>
    %268 = arith.mulf %263, %267 : vector<2x32xf32>
    %269 = vector.shape_cast %237 : vector<2x32xf32> to vector<2x1x32xf32>
    %c0_78 = arith.constant 0 : index
    %c3_79 = arith.constant 3 : index
    %c0_80 = arith.constant 0 : index
    %270 = vector.load %arg5[%c0_78, %c3_79, %c0_80] : memref<2x8x32xf32, #tpu.memory_space<vmem>>, vector<2x1x32xf32>
    tpu.vector_store %arg5[%c0_78, %c3_79, %c0_80], %269 {strides = array<i32>} : memref<2x8x32xf32, #tpu.memory_space<vmem>>, vector<2x1x32xf32>,
    %271 = vector.shape_cast %268 : vector<2x32xf32> to vector<2x1x32xf32>
    %c0_81 = arith.constant 0 : index
    %c4_82 = arith.constant 4 : index
    %c0_83 = arith.constant 0 : index
    %272 = vector.load %arg6[%c0_81, %c4_82, %c0_83] : memref<2x8x32xf32, #tpu.memory_space<vmem>>, vector<2x1x32xf32>
    tpu.vector_store %arg6[%c0_81, %c4_82, %c0_83], %271 {strides = array<i32>} : memref<2x8x32xf32, #tpu.memory_space<vmem>>, vector<2x1x32xf32>,
    %c4_84 = arith.constant 4 : index
    %c0_85 = arith.constant 0 : index
    %c0_86 = arith.constant 0 : index
    %273 = vector.load %arg1[%c4_84, %c0_85, %c0_86] : memref<8x2x128xbf16, #tpu.memory_space<vmem>>, vector<1x2x128xbf16>
    %274 = vector.shape_cast %273 : vector<1x2x128xbf16> to vector<2x128xbf16>
    %275 = arith.extf %274 : vector<2x128xbf16> to vector<2x128xf32>
    %276 = arith.truncf %237 : vector<2x32xf32> to vector<2x32xbf16>
    %cst_87 = arith.constant dense<0.000000e+00> : vector<2x128xf32>
    %277 = tpu.matmul %276, %3, %cst_87 {dimension_numbers = #tpu.dot_dimension_numbers<[1], [0], [0], [1], [0, 0, 1, 1], [], []>} : vector<2x32xbf16>, vector<32x128xbf16>, vector<2x128xf32> -> vector<2x128xf32>
    %278 = arith.addf %275, %277 : vector<2x128xf32>
    %279 = vector.extract_strided_slice %278 {offsets = [0, 0], sizes = [2, 32], strides = [1, 1]} : vector<2x128xf32> to vector<2x32xf32>
    %280 = arith.negf %279 : vector<2x32xf32>
    %281 = math.exp %280 : vector<2x32xf32>
    %cst_88 = arith.constant 1.000000e+00 : f32
    %282 = vector.broadcast %cst_88 : f32 to vector<2x32xf32>
    %283 = arith.addf %282, %281 : vector<2x32xf32>
    %284 = arith.divf %282, %283 : vector<2x32xf32>
    %285 = vector.extract_strided_slice %278 {offsets = [0, 32], sizes = [2, 32], strides = [1, 1]} : vector<2x128xf32> to vector<2x32xf32>
    %286 = arith.negf %285 : vector<2x32xf32>
    %287 = math.exp %286 : vector<2x32xf32>
    %cst_89 = arith.constant 1.000000e+00 : f32
    %288 = vector.broadcast %cst_89 : f32 to vector<2x32xf32>
    %289 = arith.addf %288, %287 : vector<2x32xf32>
    %290 = arith.divf %288, %289 : vector<2x32xf32>
    %291 = vector.extract_strided_slice %278 {offsets = [0, 64], sizes = [2, 32], strides = [1, 1]} : vector<2x128xf32> to vector<2x32xf32>
    %292 = math.tanh %291 : vector<2x32xf32>
    %293 = vector.extract_strided_slice %278 {offsets = [0, 96], sizes = [2, 32], strides = [1, 1]} : vector<2x128xf32> to vector<2x32xf32>
    %294 = arith.negf %293 : vector<2x32xf32>
    %295 = math.exp %294 : vector<2x32xf32>
    %cst_90 = arith.constant 1.000000e+00 : f32
    %296 = vector.broadcast %cst_90 : f32 to vector<2x32xf32>
    %297 = arith.addf %296, %295 : vector<2x32xf32>
    %298 = arith.divf %296, %297 : vector<2x32xf32>
    %299 = arith.mulf %290, %235 : vector<2x32xf32>
    %300 = arith.mulf %284, %292 : vector<2x32xf32>
    %301 = arith.addf %299, %300 : vector<2x32xf32>
    %302 = math.tanh %301 : vector<2x32xf32>
    %303 = arith.mulf %298, %302 : vector<2x32xf32>
    %c3_91 = arith.constant 3 : index
    %c0_92 = arith.constant 0 : index
    %c0_93 = arith.constant 0 : index
    %304 = vector.load %arg2[%c3_91, %c0_92, %c0_93] : memref<8x2x128xbf16, #tpu.memory_space<vmem>>, vector<1x2x128xbf16>
    %305 = vector.shape_cast %304 : vector<1x2x128xbf16> to vector<2x128xbf16>
    %306 = arith.extf %305 : vector<2x128xbf16> to vector<2x128xf32>
    %307 = arith.truncf %268 : vector<2x32xf32> to vector<2x32xbf16>
    %cst_94 = arith.constant dense<0.000000e+00> : vector<2x128xf32>
    %308 = tpu.matmul %307, %4, %cst_94 {dimension_numbers = #tpu.dot_dimension_numbers<[1], [0], [0], [1], [0, 0, 1, 1], [], []>} : vector<2x32xbf16>, vector<32x128xbf16>, vector<2x128xf32> -> vector<2x128xf32>
    %309 = arith.addf %306, %308 : vector<2x128xf32>
    %310 = vector.extract_strided_slice %309 {offsets = [0, 0], sizes = [2, 32], strides = [1, 1]} : vector<2x128xf32> to vector<2x32xf32>
    %311 = arith.negf %310 : vector<2x32xf32>
    %312 = math.exp %311 : vector<2x32xf32>
    %cst_95 = arith.constant 1.000000e+00 : f32
    %313 = vector.broadcast %cst_95 : f32 to vector<2x32xf32>
    %314 = arith.addf %313, %312 : vector<2x32xf32>
    %315 = arith.divf %313, %314 : vector<2x32xf32>
    %316 = vector.extract_strided_slice %309 {offsets = [0, 32], sizes = [2, 32], strides = [1, 1]} : vector<2x128xf32> to vector<2x32xf32>
    %317 = arith.negf %316 : vector<2x32xf32>
    %318 = math.exp %317 : vector<2x32xf32>
    %cst_96 = arith.constant 1.000000e+00 : f32
    %319 = vector.broadcast %cst_96 : f32 to vector<2x32xf32>
    %320 = arith.addf %319, %318 : vector<2x32xf32>
    %321 = arith.divf %319, %320 : vector<2x32xf32>
    %322 = vector.extract_strided_slice %309 {offsets = [0, 64], sizes = [2, 32], strides = [1, 1]} : vector<2x128xf32> to vector<2x32xf32>
    %323 = math.tanh %322 : vector<2x32xf32>
    %324 = vector.extract_strided_slice %309 {offsets = [0, 96], sizes = [2, 32], strides = [1, 1]} : vector<2x128xf32> to vector<2x32xf32>
    %325 = arith.negf %324 : vector<2x32xf32>
    %326 = math.exp %325 : vector<2x32xf32>
    %cst_97 = arith.constant 1.000000e+00 : f32
    %327 = vector.broadcast %cst_97 : f32 to vector<2x32xf32>
    %328 = arith.addf %327, %326 : vector<2x32xf32>
    %329 = arith.divf %327, %328 : vector<2x32xf32>
    %330 = arith.mulf %321, %266 : vector<2x32xf32>
    %331 = arith.mulf %315, %323 : vector<2x32xf32>
    %332 = arith.addf %330, %331 : vector<2x32xf32>
    %333 = math.tanh %332 : vector<2x32xf32>
    %334 = arith.mulf %329, %333 : vector<2x32xf32>
    %335 = vector.shape_cast %303 : vector<2x32xf32> to vector<2x1x32xf32>
    %c0_98 = arith.constant 0 : index
    %c4_99 = arith.constant 4 : index
    %c0_100 = arith.constant 0 : index
    %336 = vector.load %arg5[%c0_98, %c4_99, %c0_100] : memref<2x8x32xf32, #tpu.memory_space<vmem>>, vector<2x1x32xf32>
    tpu.vector_store %arg5[%c0_98, %c4_99, %c0_100], %335 {strides = array<i32>} : memref<2x8x32xf32, #tpu.memory_space<vmem>>, vector<2x1x32xf32>,
    %337 = vector.shape_cast %334 : vector<2x32xf32> to vector<2x1x32xf32>
    %c0_101 = arith.constant 0 : index
    %c3_102 = arith.constant 3 : index
    %c0_103 = arith.constant 0 : index
    %338 = vector.load %arg6[%c0_101, %c3_102, %c0_103] : memref<2x8x32xf32, #tpu.memory_space<vmem>>, vector<2x1x32xf32>
    tpu.vector_store %arg6[%c0_101, %c3_102, %c0_103], %337 {strides = array<i32>} : memref<2x8x32xf32, #tpu.memory_space<vmem>>, vector<2x1x32xf32>,
    %c5_104 = arith.constant 5 : index
    %c0_105 = arith.constant 0 : index
    %c0_106 = arith.constant 0 : index
    %339 = vector.load %arg1[%c5_104, %c0_105, %c0_106] : memref<8x2x128xbf16, #tpu.memory_space<vmem>>, vector<1x2x128xbf16>
    %340 = vector.shape_cast %339 : vector<1x2x128xbf16> to vector<2x128xbf16>
    %341 = arith.extf %340 : vector<2x128xbf16> to vector<2x128xf32>
    %342 = arith.truncf %303 : vector<2x32xf32> to vector<2x32xbf16>
    %cst_107 = arith.constant dense<0.000000e+00> : vector<2x128xf32>
    %343 = tpu.matmul %342, %3, %cst_107 {dimension_numbers = #tpu.dot_dimension_numbers<[1], [0], [0], [1], [0, 0, 1, 1], [], []>} : vector<2x32xbf16>, vector<32x128xbf16>, vector<2x128xf32> -> vector<2x128xf32>
    %344 = arith.addf %341, %343 : vector<2x128xf32>
    %345 = vector.extract_strided_slice %344 {offsets = [0, 0], sizes = [2, 32], strides = [1, 1]} : vector<2x128xf32> to vector<2x32xf32>
    %346 = arith.negf %345 : vector<2x32xf32>
    %347 = math.exp %346 : vector<2x32xf32>
    %cst_108 = arith.constant 1.000000e+00 : f32
    %348 = vector.broadcast %cst_108 : f32 to vector<2x32xf32>
    %349 = arith.addf %348, %347 : vector<2x32xf32>
    %350 = arith.divf %348, %349 : vector<2x32xf32>
    %351 = vector.extract_strided_slice %344 {offsets = [0, 32], sizes = [2, 32], strides = [1, 1]} : vector<2x128xf32> to vector<2x32xf32>
    %352 = arith.negf %351 : vector<2x32xf32>
    %353 = math.exp %352 : vector<2x32xf32>
    %cst_109 = arith.constant 1.000000e+00 : f32
    %354 = vector.broadcast %cst_109 : f32 to vector<2x32xf32>
    %355 = arith.addf %354, %353 : vector<2x32xf32>
    %356 = arith.divf %354, %355 : vector<2x32xf32>
    %357 = vector.extract_strided_slice %344 {offsets = [0, 64], sizes = [2, 32], strides = [1, 1]} : vector<2x128xf32> to vector<2x32xf32>
    %358 = math.tanh %357 : vector<2x32xf32>
    %359 = vector.extract_strided_slice %344 {offsets = [0, 96], sizes = [2, 32], strides = [1, 1]} : vector<2x128xf32> to vector<2x32xf32>
    %360 = arith.negf %359 : vector<2x32xf32>
    %361 = math.exp %360 : vector<2x32xf32>
    %cst_110 = arith.constant 1.000000e+00 : f32
    %362 = vector.broadcast %cst_110 : f32 to vector<2x32xf32>
    %363 = arith.addf %362, %361 : vector<2x32xf32>
    %364 = arith.divf %362, %363 : vector<2x32xf32>
    %365 = arith.mulf %356, %301 : vector<2x32xf32>
    %366 = arith.mulf %350, %358 : vector<2x32xf32>
    %367 = arith.addf %365, %366 : vector<2x32xf32>
    %368 = math.tanh %367 : vector<2x32xf32>
    %369 = arith.mulf %364, %368 : vector<2x32xf32>
    %c2_111 = arith.constant 2 : index
    %c0_112 = arith.constant 0 : index
    %c0_113 = arith.constant 0 : index
    %370 = vector.load %arg2[%c2_111, %c0_112, %c0_113] : memref<8x2x128xbf16, #tpu.memory_space<vmem>>, vector<1x2x128xbf16>
    %371 = vector.shape_cast %370 : vector<1x2x128xbf16> to vector<2x128xbf16>
    %372 = arith.extf %371 : vector<2x128xbf16> to vector<2x128xf32>
    %373 = arith.truncf %334 : vector<2x32xf32> to vector<2x32xbf16>
    %cst_114 = arith.constant dense<0.000000e+00> : vector<2x128xf32>
    %374 = tpu.matmul %373, %4, %cst_114 {dimension_numbers = #tpu.dot_dimension_numbers<[1], [0], [0], [1], [0, 0, 1, 1], [], []>} : vector<2x32xbf16>, vector<32x128xbf16>, vector<2x128xf32> -> vector<2x128xf32>
    %375 = arith.addf %372, %374 : vector<2x128xf32>
    %376 = vector.extract_strided_slice %375 {offsets = [0, 0], sizes = [2, 32], strides = [1, 1]} : vector<2x128xf32> to vector<2x32xf32>
    %377 = arith.negf %376 : vector<2x32xf32>
    %378 = math.exp %377 : vector<2x32xf32>
    %cst_115 = arith.constant 1.000000e+00 : f32
    %379 = vector.broadcast %cst_115 : f32 to vector<2x32xf32>
    %380 = arith.addf %379, %378 : vector<2x32xf32>
    %381 = arith.divf %379, %380 : vector<2x32xf32>
    %382 = vector.extract_strided_slice %375 {offsets = [0, 32], sizes = [2, 32], strides = [1, 1]} : vector<2x128xf32> to vector<2x32xf32>
    %383 = arith.negf %382 : vector<2x32xf32>
    %384 = math.exp %383 : vector<2x32xf32>
    %cst_116 = arith.constant 1.000000e+00 : f32
    %385 = vector.broadcast %cst_116 : f32 to vector<2x32xf32>
    %386 = arith.addf %385, %384 : vector<2x32xf32>
    %387 = arith.divf %385, %386 : vector<2x32xf32>
    %388 = vector.extract_strided_slice %375 {offsets = [0, 64], sizes = [2, 32], strides = [1, 1]} : vector<2x128xf32> to vector<2x32xf32>
    %389 = math.tanh %388 : vector<2x32xf32>
    %390 = vector.extract_strided_slice %375 {offsets = [0, 96], sizes = [2, 32], strides = [1, 1]} : vector<2x128xf32> to vector<2x32xf32>
    %391 = arith.negf %390 : vector<2x32xf32>
    %392 = math.exp %391 : vector<2x32xf32>
    %cst_117 = arith.constant 1.000000e+00 : f32
    %393 = vector.broadcast %cst_117 : f32 to vector<2x32xf32>
    %394 = arith.addf %393, %392 : vector<2x32xf32>
    %395 = arith.divf %393, %394 : vector<2x32xf32>
    %396 = arith.mulf %387, %332 : vector<2x32xf32>
    %397 = arith.mulf %381, %389 : vector<2x32xf32>
    %398 = arith.addf %396, %397 : vector<2x32xf32>
    %399 = math.tanh %398 : vector<2x32xf32>
    %400 = arith.mulf %395, %399 : vector<2x32xf32>
    %401 = vector.shape_cast %369 : vector<2x32xf32> to vector<2x1x32xf32>
    %c0_118 = arith.constant 0 : index
    %c5_119 = arith.constant 5 : index
    %c0_120 = arith.constant 0 : index
    %402 = vector.load %arg5[%c0_118, %c5_119, %c0_120] : memref<2x8x32xf32, #tpu.memory_space<vmem>>, vector<2x1x32xf32>
    tpu.vector_store %arg5[%c0_118, %c5_119, %c0_120], %401 {strides = array<i32>} : memref<2x8x32xf32, #tpu.memory_space<vmem>>, vector<2x1x32xf32>,
    %403 = vector.shape_cast %400 : vector<2x32xf32> to vector<2x1x32xf32>
    %c0_121 = arith.constant 0 : index
    %c2_122 = arith.constant 2 : index
    %c0_123 = arith.constant 0 : index
    %404 = vector.load %arg6[%c0_121, %c2_122, %c0_123] : memref<2x8x32xf32, #tpu.memory_space<vmem>>, vector<2x1x32xf32>
    tpu.vector_store %arg6[%c0_121, %c2_122, %c0_123], %403 {strides = array<i32>} : memref<2x8x32xf32, #tpu.memory_space<vmem>>, vector<2x1x32xf32>,
    %c6_124 = arith.constant 6 : index
    %c0_125 = arith.constant 0 : index
    %c0_126 = arith.constant 0 : index
    %405 = vector.load %arg1[%c6_124, %c0_125, %c0_126] : memref<8x2x128xbf16, #tpu.memory_space<vmem>>, vector<1x2x128xbf16>
    %406 = vector.shape_cast %405 : vector<1x2x128xbf16> to vector<2x128xbf16>
    %407 = arith.extf %406 : vector<2x128xbf16> to vector<2x128xf32>
    %408 = arith.truncf %369 : vector<2x32xf32> to vector<2x32xbf16>
    %cst_127 = arith.constant dense<0.000000e+00> : vector<2x128xf32>
    %409 = tpu.matmul %408, %3, %cst_127 {dimension_numbers = #tpu.dot_dimension_numbers<[1], [0], [0], [1], [0, 0, 1, 1], [], []>} : vector<2x32xbf16>, vector<32x128xbf16>, vector<2x128xf32> -> vector<2x128xf32>
    %410 = arith.addf %407, %409 : vector<2x128xf32>
    %411 = vector.extract_strided_slice %410 {offsets = [0, 0], sizes = [2, 32], strides = [1, 1]} : vector<2x128xf32> to vector<2x32xf32>
    %412 = arith.negf %411 : vector<2x32xf32>
    %413 = math.exp %412 : vector<2x32xf32>
    %cst_128 = arith.constant 1.000000e+00 : f32
    %414 = vector.broadcast %cst_128 : f32 to vector<2x32xf32>
    %415 = arith.addf %414, %413 : vector<2x32xf32>
    %416 = arith.divf %414, %415 : vector<2x32xf32>
    %417 = vector.extract_strided_slice %410 {offsets = [0, 32], sizes = [2, 32], strides = [1, 1]} : vector<2x128xf32> to vector<2x32xf32>
    %418 = arith.negf %417 : vector<2x32xf32>
    %419 = math.exp %418 : vector<2x32xf32>
    %cst_129 = arith.constant 1.000000e+00 : f32
    %420 = vector.broadcast %cst_129 : f32 to vector<2x32xf32>
    %421 = arith.addf %420, %419 : vector<2x32xf32>
    %422 = arith.divf %420, %421 : vector<2x32xf32>
    %423 = vector.extract_strided_slice %410 {offsets = [0, 64], sizes = [2, 32], strides = [1, 1]} : vector<2x128xf32> to vector<2x32xf32>
    %424 = math.tanh %423 : vector<2x32xf32>
    %425 = vector.extract_strided_slice %410 {offsets = [0, 96], sizes = [2, 32], strides = [1, 1]} : vector<2x128xf32> to vector<2x32xf32>
    %426 = arith.negf %425 : vector<2x32xf32>
    %427 = math.exp %426 : vector<2x32xf32>
    %cst_130 = arith.constant 1.000000e+00 : f32
    %428 = vector.broadcast %cst_130 : f32 to vector<2x32xf32>
    %429 = arith.addf %428, %427 : vector<2x32xf32>
    %430 = arith.divf %428, %429 : vector<2x32xf32>
    %431 = arith.mulf %422, %367 : vector<2x32xf32>
    %432 = arith.mulf %416, %424 : vector<2x32xf32>
    %433 = arith.addf %431, %432 : vector<2x32xf32>
    %434 = math.tanh %433 : vector<2x32xf32>
    %435 = arith.mulf %430, %434 : vector<2x32xf32>
    %c1_131 = arith.constant 1 : index
    %c0_132 = arith.constant 0 : index
    %c0_133 = arith.constant 0 : index
    %436 = vector.load %arg2[%c1_131, %c0_132, %c0_133] : memref<8x2x128xbf16, #tpu.memory_space<vmem>>, vector<1x2x128xbf16>
    %437 = vector.shape_cast %436 : vector<1x2x128xbf16> to vector<2x128xbf16>
    %438 = arith.extf %437 : vector<2x128xbf16> to vector<2x128xf32>
    %439 = arith.truncf %400 : vector<2x32xf32> to vector<2x32xbf16>
    %cst_134 = arith.constant dense<0.000000e+00> : vector<2x128xf32>
    %440 = tpu.matmul %439, %4, %cst_134 {dimension_numbers = #tpu.dot_dimension_numbers<[1], [0], [0], [1], [0, 0, 1, 1], [], []>} : vector<2x32xbf16>, vector<32x128xbf16>, vector<2x128xf32> -> vector<2x128xf32>
    %441 = arith.addf %438, %440 : vector<2x128xf32>
    %442 = vector.extract_strided_slice %441 {offsets = [0, 0], sizes = [2, 32], strides = [1, 1]} : vector<2x128xf32> to vector<2x32xf32>
    %443 = arith.negf %442 : vector<2x32xf32>
    %444 = math.exp %443 : vector<2x32xf32>
    %cst_135 = arith.constant 1.000000e+00 : f32
    %445 = vector.broadcast %cst_135 : f32 to vector<2x32xf32>
    %446 = arith.addf %445, %444 : vector<2x32xf32>
    %447 = arith.divf %445, %446 : vector<2x32xf32>
    %448 = vector.extract_strided_slice %441 {offsets = [0, 32], sizes = [2, 32], strides = [1, 1]} : vector<2x128xf32> to vector<2x32xf32>
    %449 = arith.negf %448 : vector<2x32xf32>
    %450 = math.exp %449 : vector<2x32xf32>
    %cst_136 = arith.constant 1.000000e+00 : f32
    %451 = vector.broadcast %cst_136 : f32 to vector<2x32xf32>
    %452 = arith.addf %451, %450 : vector<2x32xf32>
    %453 = arith.divf %451, %452 : vector<2x32xf32>
    %454 = vector.extract_strided_slice %441 {offsets = [0, 64], sizes = [2, 32], strides = [1, 1]} : vector<2x128xf32> to vector<2x32xf32>
    %455 = math.tanh %454 : vector<2x32xf32>
    %456 = vector.extract_strided_slice %441 {offsets = [0, 96], sizes = [2, 32], strides = [1, 1]} : vector<2x128xf32> to vector<2x32xf32>
    %457 = arith.negf %456 : vector<2x32xf32>
    %458 = math.exp %457 : vector<2x32xf32>
    %cst_137 = arith.constant 1.000000e+00 : f32
    %459 = vector.broadcast %cst_137 : f32 to vector<2x32xf32>
    %460 = arith.addf %459, %458 : vector<2x32xf32>
    %461 = arith.divf %459, %460 : vector<2x32xf32>
    %462 = arith.mulf %453, %398 : vector<2x32xf32>
    %463 = arith.mulf %447, %455 : vector<2x32xf32>
    %464 = arith.addf %462, %463 : vector<2x32xf32>
    %465 = math.tanh %464 : vector<2x32xf32>
    %466 = arith.mulf %461, %465 : vector<2x32xf32>
    %467 = vector.shape_cast %435 : vector<2x32xf32> to vector<2x1x32xf32>
    %c0_138 = arith.constant 0 : index
    %c6_139 = arith.constant 6 : index
    %c0_140 = arith.constant 0 : index
    %468 = vector.load %arg5[%c0_138, %c6_139, %c0_140] : memref<2x8x32xf32, #tpu.memory_space<vmem>>, vector<2x1x32xf32>
    tpu.vector_store %arg5[%c0_138, %c6_139, %c0_140], %467 {strides = array<i32>} : memref<2x8x32xf32, #tpu.memory_space<vmem>>, vector<2x1x32xf32>,
    %469 = vector.shape_cast %466 : vector<2x32xf32> to vector<2x1x32xf32>
    %c0_141 = arith.constant 0 : index
    %c1_142 = arith.constant 1 : index
    %c0_143 = arith.constant 0 : index
    %470 = vector.load %arg6[%c0_141, %c1_142, %c0_143] : memref<2x8x32xf32, #tpu.memory_space<vmem>>, vector<2x1x32xf32>
    tpu.vector_store %arg6[%c0_141, %c1_142, %c0_143], %469 {strides = array<i32>} : memref<2x8x32xf32, #tpu.memory_space<vmem>>, vector<2x1x32xf32>,
    %c7_144 = arith.constant 7 : index
    %c0_145 = arith.constant 0 : index
    %c0_146 = arith.constant 0 : index
    %471 = vector.load %arg1[%c7_144, %c0_145, %c0_146] : memref<8x2x128xbf16, #tpu.memory_space<vmem>>, vector<1x2x128xbf16>
    %472 = vector.shape_cast %471 : vector<1x2x128xbf16> to vector<2x128xbf16>
    %473 = arith.extf %472 : vector<2x128xbf16> to vector<2x128xf32>
    %474 = arith.truncf %435 : vector<2x32xf32> to vector<2x32xbf16>
    %cst_147 = arith.constant dense<0.000000e+00> : vector<2x128xf32>
    %475 = tpu.matmul %474, %3, %cst_147 {dimension_numbers = #tpu.dot_dimension_numbers<[1], [0], [0], [1], [0, 0, 1, 1], [], []>} : vector<2x32xbf16>, vector<32x128xbf16>, vector<2x128xf32> -> vector<2x128xf32>
    %476 = arith.addf %473, %475 : vector<2x128xf32>
    %477 = vector.extract_strided_slice %476 {offsets = [0, 0], sizes = [2, 32], strides = [1, 1]} : vector<2x128xf32> to vector<2x32xf32>
    %478 = arith.negf %477 : vector<2x32xf32>
    %479 = math.exp %478 : vector<2x32xf32>
    %cst_148 = arith.constant 1.000000e+00 : f32
    %480 = vector.broadcast %cst_148 : f32 to vector<2x32xf32>
    %481 = arith.addf %480, %479 : vector<2x32xf32>
    %482 = arith.divf %480, %481 : vector<2x32xf32>
    %483 = vector.extract_strided_slice %476 {offsets = [0, 32], sizes = [2, 32], strides = [1, 1]} : vector<2x128xf32> to vector<2x32xf32>
    %484 = arith.negf %483 : vector<2x32xf32>
    %485 = math.exp %484 : vector<2x32xf32>
    %cst_149 = arith.constant 1.000000e+00 : f32
    %486 = vector.broadcast %cst_149 : f32 to vector<2x32xf32>
    %487 = arith.addf %486, %485 : vector<2x32xf32>
    %488 = arith.divf %486, %487 : vector<2x32xf32>
    %489 = vector.extract_strided_slice %476 {offsets = [0, 64], sizes = [2, 32], strides = [1, 1]} : vector<2x128xf32> to vector<2x32xf32>
    %490 = math.tanh %489 : vector<2x32xf32>
    %491 = vector.extract_strided_slice %476 {offsets = [0, 96], sizes = [2, 32], strides = [1, 1]} : vector<2x128xf32> to vector<2x32xf32>
    %492 = arith.negf %491 : vector<2x32xf32>
    %493 = math.exp %492 : vector<2x32xf32>
    %cst_150 = arith.constant 1.000000e+00 : f32
    %494 = vector.broadcast %cst_150 : f32 to vector<2x32xf32>
    %495 = arith.addf %494, %493 : vector<2x32xf32>
    %496 = arith.divf %494, %495 : vector<2x32xf32>
    %497 = arith.mulf %488, %433 : vector<2x32xf32>
    %498 = arith.mulf %482, %490 : vector<2x32xf32>
    %499 = arith.addf %497, %498 : vector<2x32xf32>
    %500 = math.tanh %499 : vector<2x32xf32>
    %501 = arith.mulf %496, %500 : vector<2x32xf32>
    %c0_151 = arith.constant 0 : index
    %c0_152 = arith.constant 0 : index
    %c0_153 = arith.constant 0 : index
    %502 = vector.load %arg2[%c0_151, %c0_152, %c0_153] : memref<8x2x128xbf16, #tpu.memory_space<vmem>>, vector<1x2x128xbf16>
    %503 = vector.shape_cast %502 : vector<1x2x128xbf16> to vector<2x128xbf16>
    %504 = arith.extf %503 : vector<2x128xbf16> to vector<2x128xf32>
    %505 = arith.truncf %466 : vector<2x32xf32> to vector<2x32xbf16>
    %cst_154 = arith.constant dense<0.000000e+00> : vector<2x128xf32>
    %506 = tpu.matmul %505, %4, %cst_154 {dimension_numbers = #tpu.dot_dimension_numbers<[1], [0], [0], [1], [0, 0, 1, 1], [], []>} : vector<2x32xbf16>, vector<32x128xbf16>, vector<2x128xf32> -> vector<2x128xf32>
    %507 = arith.addf %504, %506 : vector<2x128xf32>
    %508 = vector.extract_strided_slice %507 {offsets = [0, 0], sizes = [2, 32], strides = [1, 1]} : vector<2x128xf32> to vector<2x32xf32>
    %509 = arith.negf %508 : vector<2x32xf32>
    %510 = math.exp %509 : vector<2x32xf32>
    %cst_155 = arith.constant 1.000000e+00 : f32
    %511 = vector.broadcast %cst_155 : f32 to vector<2x32xf32>
    %512 = arith.addf %511, %510 : vector<2x32xf32>
    %513 = arith.divf %511, %512 : vector<2x32xf32>
    %514 = vector.extract_strided_slice %507 {offsets = [0, 32], sizes = [2, 32], strides = [1, 1]} : vector<2x128xf32> to vector<2x32xf32>
    %515 = arith.negf %514 : vector<2x32xf32>
    %516 = math.exp %515 : vector<2x32xf32>
    %cst_156 = arith.constant 1.000000e+00 : f32
    %517 = vector.broadcast %cst_156 : f32 to vector<2x32xf32>
    %518 = arith.addf %517, %516 : vector<2x32xf32>
    %519 = arith.divf %517, %518 : vector<2x32xf32>
    %520 = vector.extract_strided_slice %507 {offsets = [0, 64], sizes = [2, 32], strides = [1, 1]} : vector<2x128xf32> to vector<2x32xf32>
    %521 = math.tanh %520 : vector<2x32xf32>
    %522 = vector.extract_strided_slice %507 {offsets = [0, 96], sizes = [2, 32], strides = [1, 1]} : vector<2x128xf32> to vector<2x32xf32>
    %523 = arith.negf %522 : vector<2x32xf32>
    %524 = math.exp %523 : vector<2x32xf32>
    %cst_157 = arith.constant 1.000000e+00 : f32
    %525 = vector.broadcast %cst_157 : f32 to vector<2x32xf32>
    %526 = arith.addf %525, %524 : vector<2x32xf32>
    %527 = arith.divf %525, %526 : vector<2x32xf32>
    %528 = arith.mulf %519, %464 : vector<2x32xf32>
    %529 = arith.mulf %513, %521 : vector<2x32xf32>
    %530 = arith.addf %528, %529 : vector<2x32xf32>
    %531 = math.tanh %530 : vector<2x32xf32>
    %532 = arith.mulf %527, %531 : vector<2x32xf32>
    %533 = vector.shape_cast %501 : vector<2x32xf32> to vector<2x1x32xf32>
    %c0_158 = arith.constant 0 : index
    %c7_159 = arith.constant 7 : index
    %c0_160 = arith.constant 0 : index
    %534 = vector.load %arg5[%c0_158, %c7_159, %c0_160] : memref<2x8x32xf32, #tpu.memory_space<vmem>>, vector<2x1x32xf32>
    tpu.vector_store %arg5[%c0_158, %c7_159, %c0_160], %533 {strides = array<i32>} : memref<2x8x32xf32, #tpu.memory_space<vmem>>, vector<2x1x32xf32>,
    %535 = vector.shape_cast %532 : vector<2x32xf32> to vector<2x1x32xf32>
    %c0_161 = arith.constant 0 : index
    %c0_162 = arith.constant 0 : index
    %c0_163 = arith.constant 0 : index
    %536 = vector.load %arg6[%c0_161, %c0_162, %c0_163] : memref<2x8x32xf32, #tpu.memory_space<vmem>>, vector<2x1x32xf32>
    tpu.vector_store %arg6[%c0_161, %c0_162, %c0_163], %535 {strides = array<i32>} : memref<2x8x32xf32, #tpu.memory_space<vmem>>, vector<2x1x32xf32>,
    %c0_164 = arith.constant 0 : index
    %c0_165 = arith.constant 0 : index
    %537 = vector.load %arg9[%c0_164, %c0_165] : memref<2x32xf32, #tpu.memory_space<vmem>>, vector<2x32xf32>
    tpu.vector_store %arg9[%c0_164, %c0_165], %501 {strides = array<i32>} : memref<2x32xf32, #tpu.memory_space<vmem>>, vector<2x32xf32>,
    %c0_166 = arith.constant 0 : index
    %c0_167 = arith.constant 0 : index
    %538 = vector.load %arg10[%c0_166, %c0_167] : memref<2x32xf32, #tpu.memory_space<vmem>>, vector<2x32xf32>
    tpu.vector_store %arg10[%c0_166, %c0_167], %499 {strides = array<i32>} : memref<2x32xf32, #tpu.memory_space<vmem>>, vector<2x32xf32>,
    %c0_168 = arith.constant 0 : index
    %c0_169 = arith.constant 0 : index
    %539 = vector.load %arg11[%c0_168, %c0_169] : memref<2x32xf32, #tpu.memory_space<vmem>>, vector<2x32xf32>
    tpu.vector_store %arg11[%c0_168, %c0_169], %532 {strides = array<i32>} : memref<2x32xf32, #tpu.memory_space<vmem>>, vector<2x32xf32>,
    %c0_170 = arith.constant 0 : index
    %c0_171 = arith.constant 0 : index
    %540 = vector.load %arg12[%c0_170, %c0_171] : memref<2x32xf32, #tpu.memory_space<vmem>>, vector<2x32xf32>
    tpu.vector_store %arg12[%c0_170, %c0_171], %530 {strides = array<i32>} : memref<2x32xf32, #tpu.memory_space<vmem>>, vector<2x32xf32>,
    %c0_i32_172 = arith.constant 0 : i32
    %541 = arith.cmpi eq, %arg0, %c0_i32_172 : i32
    %542 = arith.extui %541 : i1 to i32
    %c0_i32_173 = arith.constant 0 : i32
    %543 = arith.cmpi ne, %542, %c0_i32_173 : i32
    scf.if %543 {
      %c0_174 = arith.constant 0 : index
      %c0_175 = arith.constant 0 : index
      %c0_176 = arith.constant 0 : index
      %544 = vector.load %arg7[%c0_174, %c0_175, %c0_176] : memref<2x2x32xf32, #tpu.memory_space<vmem>>, vector<1x2x32xf32>
      %545 = vector.shape_cast %544 : vector<1x2x32xf32> to vector<2x32xf32>
      %546 = vector.shape_cast %501 : vector<2x32xf32> to vector<1x2x32xf32>
      tpu.vector_store %arg7[%c0_174, %c0_175, %c0_176], %546 {strides = array<i32>} : memref<2x2x32xf32, #tpu.memory_space<vmem>>, vector<1x2x32xf32>,
      %c1_177 = arith.constant 1 : index
      %c0_178 = arith.constant 0 : index
      %c0_179 = arith.constant 0 : index
      %547 = vector.load %arg7[%c1_177, %c0_178, %c0_179] : memref<2x2x32xf32, #tpu.memory_space<vmem>>, vector<1x2x32xf32>
      %548 = vector.shape_cast %547 : vector<1x2x32xf32> to vector<2x32xf32>
      %549 = vector.shape_cast %532 : vector<2x32xf32> to vector<1x2x32xf32>
      tpu.vector_store %arg7[%c1_177, %c0_178, %c0_179], %549 {strides = array<i32>} : memref<2x2x32xf32, #tpu.memory_space<vmem>>, vector<1x2x32xf32>,
      %c0_180 = arith.constant 0 : index
      %c0_181 = arith.constant 0 : index
      %c0_182 = arith.constant 0 : index
      %550 = vector.load %arg8[%c0_180, %c0_181, %c0_182] : memref<2x2x32xf32, #tpu.memory_space<vmem>>, vector<1x2x32xf32>
      %551 = vector.shape_cast %550 : vector<1x2x32xf32> to vector<2x32xf32>
      %552 = vector.shape_cast %499 : vector<2x32xf32> to vector<1x2x32xf32>
      tpu.vector_store %arg8[%c0_180, %c0_181, %c0_182], %552 {strides = array<i32>} : memref<2x2x32xf32, #tpu.memory_space<vmem>>, vector<1x2x32xf32>,
      %c1_183 = arith.constant 1 : index
      %c0_184 = arith.constant 0 : index
      %c0_185 = arith.constant 0 : index
      %553 = vector.load %arg8[%c1_183, %c0_184, %c0_185] : memref<2x2x32xf32, #tpu.memory_space<vmem>>, vector<1x2x32xf32>
      %554 = vector.shape_cast %553 : vector<1x2x32xf32> to vector<2x32xf32>
      %555 = vector.shape_cast %530 : vector<2x32xf32> to vector<1x2x32xf32>
      tpu.vector_store %arg8[%c1_183, %c0_184, %c0_185], %555 {strides = array<i32>} : memref<2x2x32xf32, #tpu.memory_space<vmem>>, vector<1x2x32xf32>,
    } else {
    }
    return
  }
  func.func @transform_0(%arg0: i32) -> (i32, i32, i32) {
    %c0_i32 = arith.constant 0 : i32
    %c0_i32_0 = arith.constant 0 : i32
    %c0_i32_1 = arith.constant 0 : i32
    return %arg0, %c0_i32, %c0_i32_0 : i32, i32, i32
  }
  func.func @transform_1(%arg0: i32) -> (i32, i32, i32) {
    %c0_i32 = arith.constant 0 : i32
    %0 = arith.subi %c0_i32, %arg0 : i32
    %c0_i32_0 = arith.constant 0 : i32
    %c0_i32_1 = arith.constant 0 : i32
    %c0_i32_2 = arith.constant 0 : i32
    return %0, %c0_i32_0, %c0_i32_1 : i32, i32, i32
  }
  func.func @transform_2(%arg0: i32) -> (i32, i32) {
    %c0_i32 = arith.constant 0 : i32
    %c0_i32_0 = arith.constant 0 : i32
    %c0_i32_1 = arith.constant 0 : i32
    return %c0_i32, %c0_i32_0 : i32, i32
  }
  func.func @transform_3(%arg0: i32) -> (i32, i32) {
    %c0_i32 = arith.constant 0 : i32
    %c0_i32_0 = arith.constant 0 : i32
    %c0_i32_1 = arith.constant 0 : i32
    return %c0_i32, %c0_i32_0 : i32, i32
  }
  func.func @transform_4(%arg0: i32) -> (i32, i32, i32) {
    %c0_i32 = arith.constant 0 : i32
    %c0_i32_0 = arith.constant 0 : i32
    %c0_i32_1 = arith.constant 0 : i32
    return %c0_i32, %arg0, %c0_i32_0 : i32, i32, i32
  }
  func.func @transform_5(%arg0: i32) -> (i32, i32, i32) {
    %c0_i32 = arith.constant 0 : i32
    %0 = arith.subi %c0_i32, %arg0 : i32
    %c0_i32_0 = arith.constant 0 : i32
    %c0_i32_1 = arith.constant 0 : i32
    %c0_i32_2 = arith.constant 0 : i32
    return %c0_i32_0, %0, %c0_i32_1 : i32, i32, i32
  }
  func.func @transform_6(%arg0: i32) -> (i32, i32, i32) {
    %c0_i32 = arith.constant 0 : i32
    %c0_i32_0 = arith.constant 0 : i32
    %c0_i32_1 = arith.constant 0 : i32
    %c0_i32_2 = arith.constant 0 : i32
    return %c0_i32, %c0_i32_0, %c0_i32_1 : i32, i32, i32
  }
  func.func @transform_7(%arg0: i32) -> (i32, i32, i32) {
    %c0_i32 = arith.constant 0 : i32
    %c0_i32_0 = arith.constant 0 : i32
    %c0_i32_1 = arith.constant 0 : i32
    %c0_i32_2 = arith.constant 0 : i32
    return %c0_i32, %c0_i32_0, %c0_i32_1 : i32, i32, i32
  }
}

</mosaic_0001>

<bundles_post_ra>
// kernel: encoder_forward.2
= control target key start
LH: loop header
LB: loop body
LE: loop exit
PB: predicated region body
PF: predicated region fallthrough
CT: control target
= control target key end

     0   :  { %v220_v0 = vmov 0.0   ;;  %vm221_vm0 = vmmov 0   ;;  %vm45_vm1 = vcmask 130048   ;;  %s278_s1 = inlined_call_operand.vmem [shape: bf16[16,128], index: 1, kind: input, shape index: {}]   ;;  %s279_s3 = inlined_call_operand.vmem [shape: bf16[16,128], index: 3, kind: input, shape index: {}]   ;;  %s280_s0 = inlined_call_operand.vmem [shape: bf16[16,16], index: 0, kind: input, shape index: {}]   ;;  %s281_s2 = inlined_call_operand.vmem [shape: f32[1,128], index: 2, kind: input, shape index: {}]   ;;  %s282_s4 = inlined_call_operand.vmem [shape: f32[1,128], index: 4, kind: input, shape index: {}]   ;;  %s283_s5 = inlined_call_operand.vmem [shape: bf16[16,128], index: 5, kind: output, shape index: {0}]   ;;  %s284_s6 = inlined_call_operand.vmem [shape: bf16[16,128], index: 6, kind: output, shape index: {1}]  }
   0x1   :  { %203 = vmatprep.subr.bf16.mxu0 %v220_v0  ;;  %209 = vmatprep.subr.bf16.mxu1 %v220_v0  ;;  %v217_v1 = vld [vmem:[%s278_s1] sm:$0xff]  }
   0x2   :  { %v218_v2 = vld [vmem:[%s279_s3] sm:$0xff]   ;;  %205 = vmatprep.mubr.msk.bf16.mxu0 %vm221_vm0, %v220_v0  ;;  %211 = vmatprep.mubr.msk.bf16.mxu1 %vm221_vm0, %v220_v0 }
   0x3   :  { %204 = vmatpush3.bf16.msra.mxu0 %v217_v1  ;;  %v219_v3 = vld [vmem:[%s280_s0] sm:$0xff]   ;;  %210 = vmatpush3.bf16.msra.mxu1 %v218_v2 }
   0x4   :  { %v174_v4 = vld [vmem:[%s281_s2] ss:$0 sm:$0xff] }
   0x5   :  { %v178_v6 = vld [vmem:[%s282_s4] ss:$0 sm:$0xff] }
   0x6   :  { %206 = vmatmul.mubr.msk.bf16.vlgmr.msra.gmra.mrb[0].mxu0 %vm45_vm1, %v219_v3  ;;  %212 = vmatmul.mubr.msk.bf16.vlgmr.msra.gmra.mrb[0].mxu1 %vm45_vm1, %v219_v3 }
  0xd9   :  { %v83_v5 = vpop.f32.mrb[0].mxu0  ;;  %v139_v7 = vpop.f32.mrb[0].mxu1 }
  0xda   :  { %v207_v8 = vpop.f32.mrb[1].mxu0  ;;  %v213_v9 = vpop.f32.mrb[1].mxu1  ;;  %v84_v11 = vadd.f32 %v174_v4, %v83_v5  ;;  %v140_v15 = vadd.f32 %v178_v6, %v139_v7 }
  0xdb   :  { %v86_v10 = vpop.f32.mrb[2].mxu0  ;;  %v142_v13 = vpop.f32.mrb[2].mxu1 }
  0xdc   :  { %v87_v12 = vadd.f32 %v174_v4, %v86_v10  ;;  %v208_v14 = vpop.f32.mrb[3].mxu0  ;;  %v143_v16 = vadd.f32 %v178_v6, %v142_v13  ;;  %v214_v17 = vpop.f32.mrb[3].mxu1 }
  0xde   :  { %v192_v18 = vpack.c.bf16 %v87_v12, %v84_v11  ;;  %v197_v19 = vpack.c.bf16 %v143_v16, %v140_v15 }
  0xe0   :  { %193 = vst [vmem:[%s283_s5] sm:$0xff] %v192_v18   ;;  %198 = vst [vmem:[%s284_s6] sm:$0xff] %v197_v19  }

// kernel: encoder_forward.3
= control target key start
LH: loop header
LB: loop body
LE: loop exit
PB: predicated region body
PF: predicated region fallthrough
CT: control target
= control target key end

     0   :  { %13 = vsyncpa [#allocation7], 0  ;;  %v2251_v1 = vmov 0.0   ;;  %vm2252_vm0 = vmmov 0   ;;  %vm58_vm1 = vcmask 254976   ;;  %s2947_s0 = inlined_call_operand.vmem [shape: bf16[8,2,128], index: 0, kind: input, shape index: {}]   ;;  %s2948_s1 = inlined_call_operand.vmem [shape: bf16[8,2,128], index: 1, kind: input, shape index: {}]   ;;  %s2949_s2 = inlined_call_operand.vmem [shape: bf16[32,128], index: 2, kind: input, shape index: {}]   ;;  %s2950_s3 = inlined_call_operand.vmem [shape: bf16[32,128], index: 3, kind: input, shape index: {}]   ;;  %s2951_s4 = inlined_call_operand.vmem [shape: f32[2,8,32], index: 4, kind: output, shape index: {0}]   ;;  %s2952_s5 = inlined_call_operand.vmem [shape: f32[2,8,32], index: 5, kind: output, shape index: {1}]   ;;  %s2953_s6 = inlined_call_operand.hbm [shape: f32[2,2,32], index: 6, kind: output, shape index: {2}]   ;;  %s2954_s7 = inlined_call_operand.hbm [shape: f32[2,2,32], index: 7, kind: output, shape index: {3}]  }
   0x1   :  { %v2304_v0 = vld [vmem:[%s2949_s2] sm:$0xff]   ;;  %1933 = vmatprep.subr.bf16.mxu0 %v2251_v1  ;;  %1941 = vmatprep.subr.bf16.mxu1 %v2251_v1  ;;  %v2317_v3 = vld [vmem:[%s2949_s2 + $0x8] sm:$0xff]   ;;  %59 = vst.msk [vmem:[#allocation2] sm:$0x3] %vm58_vm1, %v2251_v1  ;;  %60 = vst.msk [vmem:[#allocation3] sm:$0x3] %vm58_vm1, %v2251_v1 }
   0x2   :  { %v2311_v2 = vld [vmem:[%s2950_s3] sm:$0xff]   ;;  %1934 = vmatpush3.bf16.msra.mxu0 %v2304_v0  ;;  %1937 = vmatprep.mubr.msk.bf16.mxu0 %vm2252_vm0, %v2251_v1  ;;  %v2326_v4 = vld [vmem:[%s2950_s3 + $0x8] sm:$0xff]   ;;  %61 = vst.msk [vmem:[#allocation4] sm:$0x3] %vm58_vm1, %v2251_v1  ;;  %62 = vst.msk [vmem:[#allocation5] sm:$0x3] %vm58_vm1, %v2251_v1 }
   0x3   :  { %1942 = vmatpush3.bf16.msra.mxu1 %v2311_v2  ;;  %1935 = vmatprep.subr.bf16.mxu0 %v2251_v1 }
   0x4   :  { %1943 = vmatprep.subr.bf16.mxu1 %v2251_v1  ;;  %1945 = vmatprep.mubr.msk.bf16.mxu1 %vm2252_vm0, %v2251_v1 }
   0x5   :  { %14 = vsyncpa [#allocation9], 0  ;;  %vm90_vm2 = vcmask 261120   ;;  %s2253_s2 = smov 32   ;;  %v75_v11 = vld [vmem:[%s2947_s0] sm:$0x1] }
   0x6   :  { %1936 = vmatpush3.bf16.msra.mxu0 %v2317_v3  ;;  %v1838_v12 = vld [vmem:[%s2948_s1 + $0x7] sm:$0x1]  ;;  %v76_v13 = vunpack.c.l.bf16 %v75_v11  ;;  %s2254_s12 = smov 64   ;;  %v1844_v57 = vld [vmem:[%s2947_s0 + $0x1] sm:$0x1]  ;;  %vm288_vm3 = vcmask 253952  }
   0x7   :  { %1944 = vmatpush3.bf16.msra.mxu1 %v2326_v4  ;;  %1949 = vmatprep.subr.bf16.mxu0 %v2251_v1  ;;  %v172_v14 = vunpack.c.l.bf16 %v1838_v12  ;;  %v318_v58 = vunpack.c.l.bf16 %v1844_v57  ;;  %v1847_v59 = vld [vmem:[%s2948_s1 + $0x6] sm:$0x1]  ;;  %s2258_s30 = smov [#allocation8]  }
   0x8   :  { %1957 = vmatprep.subr.bf16.mxu1 %v2251_v1  ;;  %v71_v5 = vld [vmem:[#allocation2] sm:$0x3]  ;;  %v1837_v9 = vld.sshfl [vmem:[#allocation3] sm:$0x3 pattern:$0x76325410]  ;;  %v393_v63 = vunpack.c.l.bf16 %v1847_v59 }
   0x9   :  { %v73_v6 = vld [vmem:[#allocation4] sm:$0x3]  ;;  %v77_v7 = vpack.c.bf16 %v71_v5, %v71_v5  ;;  %150 = vrot.lane.b32.xlu1 %v1837_v9, %s2253_s2  ;;  %v1843_v10 = vld.sshfl [vmem:[#allocation5] sm:$0x3 pattern:$0x76325410] }
   0xa   :  { %v173_v8 = vpack.c.bf16 %v73_v6, %v73_v6  ;;  %s1798_s8 = sshll.u32 %s2258_s30, 4  ;;  %s1799_s8 = int_to_ptr.vmem [resolvable:$true] %s1798_s8 }
   0xb   :  { %1938 = vmatmul.mubr.msk.bf16.vlgmr.msra.gmra.mrb[0].mxu0 %vm90_vm2, %v77_v7  ;;  %s2203_s13 = scalar_lea.vmem %s1799_s8, 64  ;;  %p2208_p1 = scmp.lt.s32.totalorder %s1799_s8, %s1799_s8 }
   0xc   :  { %1946 = vmatmul.mubr.msk.bf16.vlgmr.msra.gmra.mrb[0].mxu1 %vm90_vm2, %v173_v8  ;;  %1950 = vmatpush3.bf16.msra.mxu0 %v2304_v0  ;;  %p2204_p0 = scmp.ne.s32.totalorder %s1799_s8, %s2203_s13  ;;  %p2209_p2 = scmp.lt.s32.totalorder %s2203_s13, %s2203_s13 }
   0xd   :  { %1958 = vmatpush3.bf16.msra.mxu1 %v2311_v2  ;;  %1951 = vmatprep.subr.bf16.mxu0 %v2251_v1 }
   0xe   :  { %1953 = vmatprep.mubr.msk.bf16.mxu0 %vm2252_vm0, %v2251_v1  ;;  %245 = vrot.lane.b32.xlu1 %v1843_v10, %s2253_s2  ;;  %p2210_p3 = por %p2209_p2, %p2208_p1 }
   0xf   :  { %1959 = vmatprep.subr.bf16.mxu1 %v2251_v1  ;;  %1961 = vmatprep.mubr.msk.bf16.mxu1 %vm2252_vm0, %v2251_v1 }
  0x10   :  { %1952 = vmatpush3.bf16.msra.mxu0 %v2317_v3  ;;  %p2211_p4 = pnand %p2210_p3, %p2204_p0 }
  0x11   :  { %1960 = vmatpush3.bf16.msra.mxu1 %v2326_v4  ;;  %1965 = vmatprep.subr.bf16.mxu0 %v2251_v1 }
  0x12   :  { %1973 = vmatprep.subr.bf16.mxu1 %v2251_v1 }
  0x7b   :  { %v151_v39 = vpop.permute.xlu1 %150 }
  0x80   :  { %v246_v41 = vpop.permute.xlu1 %245 }
  0xde   :  { %v128_v15 = vpop.f32.mrb[0].mxu0 }
  0xdf   :  { %v223_v16 = vpop.f32.mrb[0].mxu1  ;;  %v134_v17 = vadd.f32 %v128_v15, %v76_v13  ;;  %v1939_v18 = vpop.f32.mrb[1].mxu0 }
  0xe0   :  { %v229_v19 = vadd.f32 %v223_v16, %v172_v14  ;;  %v1947_v20 = vpop.f32.mrb[1].mxu1  ;;  %v131_v21 = vpop.f32.mrb[2].mxu0 }
  0xe1   :  { %v226_v22 = vpop.f32.mrb[2].mxu1  ;;  %2075 = vtanh.f32 %v134_v17  ;;  %v1940_v23 = vpop.f32.mrb[3].mxu0  ;;  %v1836_v27 = vmul.f32 -1.442695, %v134_v17 }
  0xe2   :  { %v1948_v24 = vpop.f32.mrb[3].mxu1  ;;  %2077 = vtanh.f32 %v229_v19  ;;  %v1842_v28 = vmul.f32 -1.442695, %v229_v19 }
  0xe3   :  { %2079 = vpow2.f32 %v1836_v27 }
  0xe4   :  { %2081 = vpow2.f32 %v1842_v28 }
  0xeb   :  { %v2076_v25 = vpop.eup %2075 }
  0xec   :  { %155 = vrot.lane.b32.xlu0 %v2076_v25, %s2254_s12  ;;  %v2078_v26 = vpop.eup %2077 }
  0xed   :  { %v2080_v29 = vpop.eup %2079 }
  0xee   :  { %v138_v30 = vadd.f32 1.0, %v2080_v29  ;;  %v2082_v31 = vpop.eup %2081 }
  0xef   :  { %v233_v32 = vadd.f32 1.0, %v2082_v31 }
  0xf0   :  { %250 = vrot.lane.b32.xlu0 %v2078_v26, %s2254_s12  ;;  %2083 = vrcp.f32 %v138_v30 }
  0xf1   :  { %2085 = vrcp.f32 %v233_v32 }
  0xfa   :  { %v2084_v33 = vpop.eup %2083 }
  0xfb   :  { %v2086_v36 = vpop.eup %2085  ;;  %v153_v40 = vmul.f32 %v2084_v33, %v151_v39 }
  0xfc   :  { %v248_v44 = vmul.f32 %v2086_v36, %v246_v41 }
 0x15e   :  { %v156_v34 = vpop.permute.xlu0 %155 }
 0x15f   :  { %v158_v35 = vmul.f32 %v2084_v33, %v156_v34 }
 0x161   :  { %160 = vrot.lane.b32.xlu0 %v158_v35, %s2253_s2 }
 0x162   :  { %v251_v37 = vpop.permute.xlu0 %250 }
 0x163   :  { %v253_v38 = vmul.f32 %v2086_v36, %v251_v37 }
 0x165   :  { %255 = vrot.lane.b32.xlu1 %v253_v38, %s2253_s2 }
 0x1d3   :  { %v161_v42 = vpop.permute.xlu0 %160 }
 0x1d4   :  { %v2369_v43 = vadd.f32 %v161_v42, %v153_v40  ;;  %v1850_v42 = vld [vmem:[%s2947_s0 + $0x2] sm:$0x1] }
 0x1d6   :  { %2087 = vtanh.f32 %v2369_v43 }
 0x1d7   :  { %v256_v45 = vpop.permute.xlu1 %255 }
 0x1d8   :  { %v2372_v46 = vadd.f32 %v256_v45, %v248_v44  ;;  %v1853_v44 = vld [vmem:[%s2948_s1 + $0x5] sm:$0x1] }
 0x1da   :  { %2089 = vtanh.f32 %v2372_v46 }
 0x1e0   :  { %v2088_v47 = vpop.eup %2087 }
 0x1e1   :  { %166 = vrot.lane.b32.xlu0 %v2088_v47, %s2254_s12 }
 0x1e4   :  { %v2090_v48 = vpop.eup %2089 }
 0x1e5   :  { %261 = vrot.lane.b32.xlu1 %v2090_v48, %s2254_s12  ;;  %v593_v48 = vunpack.c.l.bf16 %v1853_v44 }
 0x253   :  { %v167_v49 = vpop.permute.xlu0 %166 }
 0x254   :  { %v2377_v50 = vmul.f32 %v2084_v33, %v167_v49 }
 0x256   :  { %v319_v51 = vpack.c.bf16 %v2377_v50, %v2377_v50 }
 0x257   :  { %v262_v52 = vpop.permute.xlu1 %261 }
 0x258   :  { %v2381_v53 = vmul.f32 %v2086_v36, %v262_v52  ;;  %321 = vrot.lane.b32.xlu0 %v319_v51, %s2253_s2 }
 0x25a   :  { %v394_v54 = vpack.c.bf16 %v2381_v53, %v2381_v53 }
 0x25c   :  { %396 = vrot.lane.b32.xlu1 %v394_v54, %s2253_s2 }
 0x2ca   :  { %v322_v55 = vpop.permute.xlu0 %321 }
 0x2cb   :  { %1954 = vmatmul.mubr.msk.bf16.vlgmr.msra.gmra.mrb[4].mxu0 %vm90_vm2, %v322_v55 }
 0x2cc   :  { %1966 = vmatpush3.bf16.msra.mxu0 %v2304_v0  ;;  %1969 = vmatprep.mubr.msk.bf16.mxu0 %vm2252_vm0, %v2251_v1 }
 0x2cd   :  { %1967 = vmatprep.subr.bf16.mxu0 %v2251_v1 }
 0x2ce   :  { %v397_v56 = vpop.permute.xlu1 %396 }
 0x2cf   :  { %1962 = vmatmul.mubr.msk.bf16.vlgmr.msra.gmra.mrb[4].mxu1 %vm90_vm2, %v397_v56 }
 0x2d0   :  { %1968 = vmatpush3.bf16.msra.mxu0 %v2317_v3  ;;  %1974 = vmatpush3.bf16.msra.mxu1 %v2311_v2 }
 0x2d1   :  { %1975 = vmatprep.subr.bf16.mxu1 %v2251_v1  ;;  %1977 = vmatprep.mubr.msk.bf16.mxu1 %vm2252_vm0, %v2251_v1 }
 0x2d2   :  { %1981 = vmatprep.subr.bf16.mxu0 %v2251_v1 }
 0x2d4   :  { %1976 = vmatpush3.bf16.msra.mxu1 %v2326_v4 }
 0x2d5   :  { %1989 = vmatprep.subr.bf16.mxu1 %v2251_v1 }
 0x39e   :  { %v360_v60 = vpop.f32.mrb[4].mxu0 }
 0x39f   :  { %v366_v61 = vadd.f32 %v360_v60, %v318_v58  ;;  %v1955_v62 = vpop.f32.mrb[5].mxu0 }
 0x3a0   :  { %v363_v5 = vpop.f32.mrb[6].mxu0 }
 0x3a1   :  { %2091 = vtanh.f32 %v366_v61  ;;  %v1956_v6 = vpop.f32.mrb[7].mxu0  ;;  %v1846_v14 = vmul.f32 -1.442695, %v366_v61 }
 0x3a2   :  { %v435_v7 = vpop.f32.mrb[4].mxu1 }
 0x3a3   :  { %v441_v8 = vadd.f32 %v435_v7, %v393_v63  ;;  %v1963_v9 = vpop.f32.mrb[5].mxu1 }
 0x3a4   :  { %v438_v10 = vpop.f32.mrb[6].mxu1 }
 0x3a5   :  { %2093 = vtanh.f32 %v441_v8  ;;  %v1964_v11 = vpop.f32.mrb[7].mxu1  ;;  %v1849_v15 = vmul.f32 -1.442695, %v441_v8 }
 0x3a6   :  { %2095 = vpow2.f32 %v1846_v14 }
 0x3a7   :  { %2097 = vpow2.f32 %v1849_v15 }
 0x3ab   :  { %v2092_v12 = vpop.eup %2091 }
 0x3ac   :  { %376 = vrot.lane.b32.xlu0 %v2092_v12, %s2254_s12 }
 0x3af   :  { %v2094_v13 = vpop.eup %2093 }
 0x3b0   :  { %451 = vrot.lane.b32.xlu1 %v2094_v13, %s2254_s12  ;;  %v2096_v16 = vpop.eup %2095 }
 0x3b1   :  { %v370_v17 = vadd.f32 1.0, %v2096_v16  ;;  %v2098_v18 = vpop.eup %2097 }
 0x3b2   :  { %v445_v19 = vadd.f32 1.0, %v2098_v18 }
 0x3b3   :  { %2099 = vrcp.f32 %v370_v17 }
 0x3b4   :  { %2101 = vrcp.f32 %v445_v19 }
 0x3bd   :  { %v2100_v20 = vpop.eup %2099 }
 0x3be   :  { %v2102_v23 = vpop.eup %2101  ;;  %v374_v26 = vmul.f32 %v2100_v20, %v2369_v43  ;;  %v518_v43 = vunpack.c.l.bf16 %v1850_v42 }
 0x3bf   :  { %v449_v29 = vmul.f32 %v2102_v23, %v2372_v46 }
 0x41e   :  { %v377_v21 = vpop.permute.xlu0 %376 }
 0x41f   :  { %v379_v22 = vmul.f32 %v2100_v20, %v377_v21 }
 0x421   :  { %381 = vrot.lane.b32.xlu0 %v379_v22, %s2253_s2 }
 0x422   :  { %v452_v24 = vpop.permute.xlu1 %451 }
 0x423   :  { %v454_v25 = vmul.f32 %v2102_v23, %v452_v24 }
 0x425   :  { %456 = vrot.lane.b32.xlu1 %v454_v25, %s2253_s2 }
 0x493   :  { %v382_v27 = vpop.permute.xlu0 %381 }
 0x494   :  { %v2412_v28 = vadd.f32 %v382_v27, %v374_v26 }
 0x496   :  { %2103 = vtanh.f32 %v2412_v28 }
 0x497   :  { %v457_v30 = vpop.permute.xlu1 %456 }
 0x498   :  { %v2416_v31 = vadd.f32 %v457_v30, %v449_v29  ;;  %v1856_v29 = vld [vmem:[%s2947_s0 + $0x3] sm:$0x1] }
 0x499   :  { %v718_v30 = vunpack.c.l.bf16 %v1856_v29 }
 0x49a   :  { %2105 = vtanh.f32 %v2416_v31 }
 0x4a0   :  { %v2104_v32 = vpop.eup %2103 }
 0x4a1   :  { %387 = vrot.lane.b32.xlu0 %v2104_v32, %s2254_s12 }
 0x4a4   :  { %v2106_v33 = vpop.eup %2105 }
 0x4a5   :  { %462 = vrot.lane.b32.xlu1 %v2106_v33, %s2254_s12 }
 0x513   :  { %v388_v34 = vpop.permute.xlu0 %387 }
 0x514   :  { %v2421_v35 = vmul.f32 %v2100_v20, %v388_v34 }
 0x516   :  { %v519_v36 = vpack.c.bf16 %v2421_v35, %v2421_v35 }
 0x517   :  { %v463_v37 = vpop.permute.xlu1 %462 }
 0x518   :  { %v2425_v38 = vmul.f32 %v2102_v23, %v463_v37  ;;  %521 = vrot.lane.b32.xlu0 %v519_v36, %s2253_s2 }
 0x51a   :  { %v594_v39 = vpack.c.bf16 %v2425_v38, %v2425_v38 }
 0x51c   :  { %596 = vrot.lane.b32.xlu1 %v594_v39, %s2253_s2 }
 0x58a   :  { %v522_v40 = vpop.permute.xlu0 %521 }
 0x58b   :  { %1970 = vmatmul.mubr.msk.bf16.vlgmr.msra.gmra.mrb[8].mxu0 %vm90_vm2, %v522_v40 }
 0x58c   :  { %1982 = vmatpush3.bf16.msra.mxu0 %v2304_v0  ;;  %1985 = vmatprep.mubr.msk.bf16.mxu0 %vm2252_vm0, %v2251_v1 }
 0x58d   :  { %1983 = vmatprep.subr.bf16.mxu0 %v2251_v1 }
 0x58e   :  { %v597_v41 = vpop.permute.xlu1 %596 }
 0x58f   :  { %1978 = vmatmul.mubr.msk.bf16.vlgmr.msra.gmra.mrb[8].mxu1 %vm90_vm2, %v597_v41 }
 0x590   :  { %1984 = vmatpush3.bf16.msra.mxu0 %v2317_v3  ;;  %1990 = vmatpush3.bf16.msra.mxu1 %v2311_v2 }
 0x591   :  { %1991 = vmatprep.subr.bf16.mxu1 %v2251_v1  ;;  %1993 = vmatprep.mubr.msk.bf16.mxu1 %vm2252_vm0, %v2251_v1 }
 0x592   :  { %1997 = vmatprep.subr.bf16.mxu0 %v2251_v1 }
 0x594   :  { %1992 = vmatpush3.bf16.msra.mxu1 %v2326_v4 }
 0x595   :  { %2005 = vmatprep.subr.bf16.mxu1 %v2251_v1 }
 0x65e   :  { %v560_v45 = vpop.f32.mrb[8].mxu0 }
 0x65f   :  { %v566_v46 = vadd.f32 %v560_v45, %v518_v43  ;;  %v1971_v47 = vpop.f32.mrb[9].mxu0 }
 0x660   :  { %v563_v49 = vpop.f32.mrb[10].mxu0 }
 0x661   :  { %2107 = vtanh.f32 %v566_v46  ;;  %v1972_v51 = vpop.f32.mrb[11].mxu0  ;;  %v1852_v60 = vmul.f32 -1.442695, %v566_v46 }
 0x662   :  { %v635_v52 = vpop.f32.mrb[8].mxu1 }
 0x663   :  { %v641_v54 = vadd.f32 %v635_v52, %v593_v48  ;;  %v1979_v55 = vpop.f32.mrb[9].mxu1 }
 0x664   :  { %v638_v56 = vpop.f32.mrb[10].mxu1 }
 0x665   :  { %2109 = vtanh.f32 %v641_v54  ;;  %v1980_v57 = vpop.f32.mrb[11].mxu1  ;;  %v1855_v61 = vmul.f32 -1.442695, %v641_v54 }
 0x666   :  { %2111 = vpow2.f32 %v1852_v60 }
 0x667   :  { %2113 = vpow2.f32 %v1855_v61 }
 0x66b   :  { %v2108_v58 = vpop.eup %2107 }
 0x66c   :  { %576 = vrot.lane.b32.xlu0 %v2108_v58, %s2254_s12 }
 0x66f   :  { %v2110_v59 = vpop.eup %2109 }
 0x670   :  { %651 = vrot.lane.b32.xlu1 %v2110_v59, %s2254_s12  ;;  %v2112_v62 = vpop.eup %2111 }
 0x671   :  { %v570_v63 = vadd.f32 1.0, %v2112_v62  ;;  %v2114_v5 = vpop.eup %2113 }
 0x672   :  { %v645_v6 = vadd.f32 1.0, %v2114_v5 }
 0x673   :  { %2115 = vrcp.f32 %v570_v63 }
 0x674   :  { %2117 = vrcp.f32 %v645_v6 }
 0x67d   :  { %v2116_v7 = vpop.eup %2115 }
 0x67e   :  { %v2118_v10 = vpop.eup %2117  ;;  %v574_v13 = vmul.f32 %v2116_v7, %v2412_v28 }
 0x67f   :  { %v649_v16 = vmul.f32 %v2118_v10, %v2416_v31  ;;  %v1859_v31 = vld [vmem:[%s2948_s1 + $0x4] sm:$0x1] }
 0x680   :  { %v793_v36 = vunpack.c.l.bf16 %v1859_v31 }
 0x6de   :  { %v577_v8 = vpop.permute.xlu0 %576 }
 0x6df   :  { %v579_v9 = vmul.f32 %v2116_v7, %v577_v8 }
 0x6e1   :  { %581 = vrot.lane.b32.xlu0 %v579_v9, %s2253_s2 }
 0x6e2   :  { %v652_v11 = vpop.permute.xlu1 %651 }
 0x6e3   :  { %v654_v12 = vmul.f32 %v2118_v10, %v652_v11 }
 0x6e5   :  { %656 = vrot.lane.b32.xlu1 %v654_v12, %s2253_s2 }
 0x753   :  { %v582_v14 = vpop.permute.xlu0 %581 }
 0x754   :  { %v2456_v15 = vadd.f32 %v582_v14, %v574_v13 }
 0x756   :  { %2119 = vtanh.f32 %v2456_v15 }
 0x757   :  { %v657_v17 = vpop.permute.xlu1 %656 }
 0x758   :  { %v2460_v18 = vadd.f32 %v657_v17, %v649_v16 }
 0x75a   :  { %2121 = vtanh.f32 %v2460_v18 }
 0x760   :  { %v2120_v19 = vpop.eup %2119 }
 0x761   :  { %587 = vrot.lane.b32.xlu0 %v2120_v19, %s2254_s12 }
 0x764   :  { %v2122_v20 = vpop.eup %2121 }
 0x765   :  { %662 = vrot.lane.b32.xlu1 %v2122_v20, %s2254_s12  ;;  %v1865_v20 = vld [vmem:[%s2948_s1 + $0x3] sm:$0x1] }
 0x7d3   :  { %v588_v21 = vpop.permute.xlu0 %587 }
 0x7d4   :  { %v2465_v22 = vmul.f32 %v2116_v7, %v588_v21 }
 0x7d6   :  { %v719_v23 = vpack.c.bf16 %v2465_v22, %v2465_v22 }
 0x7d7   :  { %v663_v24 = vpop.permute.xlu1 %662 }
 0x7d8   :  { %v2469_v25 = vmul.f32 %v2118_v10, %v663_v24  ;;  %721 = vrot.lane.b32.xlu0 %v719_v23, %s2253_s2 }
 0x7da   :  { %v794_v26 = vpack.c.bf16 %v2469_v25, %v2469_v25 }
 0x7dc   :  { %796 = vrot.lane.b32.xlu1 %v794_v26, %s2253_s2  ;;  %v993_v26 = vunpack.c.l.bf16 %v1865_v20 }
 0x84a   :  { %v722_v27 = vpop.permute.xlu0 %721 }
 0x84b   :  { %1986 = vmatmul.mubr.msk.bf16.vlgmr.msra.gmra.mrb[12].mxu0 %vm90_vm2, %v722_v27 }
 0x84c   :  { %1998 = vmatpush3.bf16.msra.mxu0 %v2304_v0  ;;  %2001 = vmatprep.mubr.msk.bf16.mxu0 %vm2252_vm0, %v2251_v1 }
 0x84d   :  { %1999 = vmatprep.subr.bf16.mxu0 %v2251_v1 }
 0x84e   :  { %v797_v28 = vpop.permute.xlu1 %796 }
 0x84f   :  { %1994 = vmatmul.mubr.msk.bf16.vlgmr.msra.gmra.mrb[12].mxu1 %vm90_vm2, %v797_v28 }
 0x850   :  { %2000 = vmatpush3.bf16.msra.mxu0 %v2317_v3  ;;  %2006 = vmatpush3.bf16.msra.mxu1 %v2311_v2 }
 0x851   :  { %2007 = vmatprep.subr.bf16.mxu1 %v2251_v1  ;;  %2009 = vmatprep.mubr.msk.bf16.mxu1 %vm2252_vm0, %v2251_v1 }
 0x852   :  { %2013 = vmatprep.subr.bf16.mxu0 %v2251_v1 }
 0x854   :  { %2008 = vmatpush3.bf16.msra.mxu1 %v2326_v4 }
 0x855   :  { %2021 = vmatprep.subr.bf16.mxu1 %v2251_v1 }
 0x91e   :  { %v760_v32 = vpop.f32.mrb[12].mxu0 }
 0x91f   :  { %v766_v33 = vadd.f32 %v760_v32, %v718_v30  ;;  %v1987_v34 = vpop.f32.mrb[13].mxu0 }
 0x920   :  { %v763_v37 = vpop.f32.mrb[14].mxu0 }
 0x921   :  { %2123 = vtanh.f32 %v766_v33  ;;  %v1988_v39 = vpop.f32.mrb[15].mxu0  ;;  %v1858_v47 = vmul.f32 -1.442695, %v766_v33 }
 0x922   :  { %v835_v40 = vpop.f32.mrb[12].mxu1 }
 0x923   :  { %v841_v41 = vadd.f32 %v835_v40, %v793_v36  ;;  %v1995_v42 = vpop.f32.mrb[13].mxu1 }
 0x924   :  { %v838_v43 = vpop.f32.mrb[14].mxu1 }
 0x925   :  { %2125 = vtanh.f32 %v841_v41  ;;  %v1996_v44 = vpop.f32.mrb[15].mxu1  ;;  %v1861_v48 = vmul.f32 -1.442695, %v841_v41 }
 0x926   :  { %2127 = vpow2.f32 %v1858_v47 }
 0x927   :  { %2129 = vpow2.f32 %v1861_v48 }
 0x92b   :  { %v2124_v45 = vpop.eup %2123 }
 0x92c   :  { %776 = vrot.lane.b32.xlu0 %v2124_v45, %s2254_s12 }
 0x92f   :  { %v2126_v46 = vpop.eup %2125 }
 0x930   :  { %851 = vrot.lane.b32.xlu1 %v2126_v46, %s2254_s12  ;;  %v2128_v49 = vpop.eup %2127 }
 0x931   :  { %v770_v51 = vadd.f32 1.0, %v2128_v49  ;;  %v2130_v52 = vpop.eup %2129 }
 0x932   :  { %v845_v54 = vadd.f32 1.0, %v2130_v52 }
 0x933   :  { %2131 = vrcp.f32 %v770_v51 }
 0x934   :  { %2133 = vrcp.f32 %v845_v54 }
 0x93d   :  { %v2132_v55 = vpop.eup %2131 }
 0x93e   :  { %v2134_v58 = vpop.eup %2133  ;;  %v774_v61 = vmul.f32 %v2132_v55, %v2456_v15 }
 0x93f   :  { %v849_v5 = vmul.f32 %v2134_v58, %v2460_v18  ;;  %v1862_v18 = vld [vmem:[%s2947_s0 + $0x4] sm:$0x1] }
 0x940   :  { %v918_v19 = vunpack.c.l.bf16 %v1862_v18 }
 0x99e   :  { %v777_v56 = vpop.permute.xlu0 %776 }
 0x99f   :  { %v779_v57 = vmul.f32 %v2132_v55, %v777_v56 }
 0x9a1   :  { %781 = vrot.lane.b32.xlu0 %v779_v57, %s2253_s2 }
 0x9a2   :  { %v852_v59 = vpop.permute.xlu1 %851 }
 0x9a3   :  { %v854_v60 = vmul.f32 %v2134_v58, %v852_v59 }
 0x9a5   :  { %856 = vrot.lane.b32.xlu1 %v854_v60, %s2253_s2 }
 0xa13   :  { %v782_v62 = vpop.permute.xlu0 %781 }
 0xa14   :  { %v2500_v63 = vadd.f32 %v782_v62, %v774_v61 }
 0xa16   :  { %2135 = vtanh.f32 %v2500_v63 }
 0xa17   :  { %v857_v6 = vpop.permute.xlu1 %856 }
 0xa18   :  { %v2504_v7 = vadd.f32 %v857_v6, %v849_v5 }
 0xa1a   :  { %2137 = vtanh.f32 %v2504_v7 }
 0xa20   :  { %v2136_v8 = vpop.eup %2135 }
 0xa21   :  { %787 = vrot.lane.b32.xlu0 %v2136_v8, %s2254_s12 }
 0xa24   :  { %v2138_v9 = vpop.eup %2137 }
 0xa25   :  { %862 = vrot.lane.b32.xlu1 %v2138_v9, %s2254_s12  ;;  %v1868_v9 = vld [vmem:[%s2947_s0 + $0x5] sm:$0x1] }
 0xa93   :  { %v788_v10 = vpop.permute.xlu0 %787 }
 0xa94   :  { %v2509_v11 = vmul.f32 %v2132_v55, %v788_v10  ;;  %v1118_v10 = vunpack.c.l.bf16 %v1868_v9 }
 0xa96   :  { %v919_v12 = vpack.c.bf16 %v2509_v11, %v2509_v11 }
 0xa97   :  { %v863_v13 = vpop.permute.xlu1 %862 }
 0xa98   :  { %v2513_v14 = vmul.f32 %v2134_v58, %v863_v13  ;;  %921 = vrot.lane.b32.xlu0 %v919_v12, %s2253_s2  ;;  %v1871_v12 = vld [vmem:[%s2948_s1 + $0x2] sm:$0x1] }
 0xa9a   :  { %v994_v15 = vpack.c.bf16 %v2513_v14, %v2513_v14 }
 0xa9c   :  { %996 = vrot.lane.b32.xlu1 %v994_v15, %s2253_s2 }
 0xb0a   :  { %v922_v16 = vpop.permute.xlu0 %921 }
 0xb0b   :  { %2002 = vmatmul.mubr.msk.bf16.vlgmr.msra.gmra.mrb[16].mxu0 %vm90_vm2, %v922_v16 }
 0xb0c   :  { %2014 = vmatpush3.bf16.msra.mxu0 %v2304_v0  ;;  %2017 = vmatprep.mubr.msk.bf16.mxu0 %vm2252_vm0, %v2251_v1 }
 0xb0d   :  { %2015 = vmatprep.subr.bf16.mxu0 %v2251_v1 }
 0xb0e   :  { %v997_v17 = vpop.permute.xlu1 %996 }
 0xb0f   :  { %2010 = vmatmul.mubr.msk.bf16.vlgmr.msra.gmra.mrb[16].mxu1 %vm90_vm2, %v997_v17  ;;  %v1193_v17 = vunpack.c.l.bf16 %v1871_v12 }
 0xb10   :  { %2016 = vmatpush3.bf16.msra.mxu0 %v2317_v3  ;;  %2022 = vmatpush3.bf16.msra.mxu1 %v2311_v2 }
 0xb11   :  { %2023 = vmatprep.subr.bf16.mxu1 %v2251_v1  ;;  %2025 = vmatprep.mubr.msk.bf16.mxu1 %vm2252_vm0, %v2251_v1 }
 0xb12   :  { %2029 = vmatprep.subr.bf16.mxu0 %v2251_v1 }
 0xb14   :  { %2024 = vmatpush3.bf16.msra.mxu1 %v2326_v4 }
 0xb15   :  { %2037 = vmatprep.subr.bf16.mxu1 %v2251_v1 }
 0xbde   :  { %v960_v21 = vpop.f32.mrb[16].mxu0 }
 0xbdf   :  { %v966_v23 = vadd.f32 %v960_v21, %v918_v19  ;;  %v2003_v24 = vpop.f32.mrb[17].mxu0 }
 0xbe0   :  { %v963_v27 = vpop.f32.mrb[18].mxu0 }
 0xbe1   :  { %2139 = vtanh.f32 %v966_v23  ;;  %v2004_v28 = vpop.f32.mrb[19].mxu0  ;;  %v1864_v37 = vmul.f32 -1.442695, %v966_v23 }
 0xbe2   :  { %v1035_v29 = vpop.f32.mrb[16].mxu1 }
 0xbe3   :  { %v1041_v30 = vadd.f32 %v1035_v29, %v993_v26  ;;  %v2011_v31 = vpop.f32.mrb[17].mxu1 }
 0xbe4   :  { %v1038_v32 = vpop.f32.mrb[18].mxu1 }
 0xbe5   :  { %2141 = vtanh.f32 %v1041_v30  ;;  %v2012_v33 = vpop.f32.mrb[19].mxu1  ;;  %v1867_v39 = vmul.f32 -1.442695, %v1041_v30 }
 0xbe6   :  { %2143 = vpow2.f32 %v1864_v37 }
 0xbe7   :  { %2145 = vpow2.f32 %v1867_v39 }
 0xbeb   :  { %v2140_v34 = vpop.eup %2139 }
 0xbec   :  { %976 = vrot.lane.b32.xlu0 %v2140_v34, %s2254_s12 }
 0xbef   :  { %v2142_v36 = vpop.eup %2141 }
 0xbf0   :  { %1051 = vrot.lane.b32.xlu1 %v2142_v36, %s2254_s12  ;;  %v2144_v40 = vpop.eup %2143 }
 0xbf1   :  { %v970_v41 = vadd.f32 1.0, %v2144_v40  ;;  %v2146_v42 = vpop.eup %2145 }
 0xbf2   :  { %v1045_v43 = vadd.f32 1.0, %v2146_v42 }
 0xbf3   :  { %2147 = vrcp.f32 %v970_v41 }
 0xbf4   :  { %2149 = vrcp.f32 %v1045_v43 }
 0xbfd   :  { %v2148_v44 = vpop.eup %2147 }
 0xbfe   :  { %v2150_v47 = vpop.eup %2149  ;;  %v974_v51 = vmul.f32 %v2148_v44, %v2500_v63 }
 0xbff   :  { %v1049_v55 = vmul.f32 %v2150_v47, %v2504_v7 }
 0xc5e   :  { %v977_v45 = vpop.permute.xlu0 %976 }
 0xc5f   :  { %v979_v46 = vmul.f32 %v2148_v44, %v977_v45 }
 0xc61   :  { %981 = vrot.lane.b32.xlu0 %v979_v46, %s2253_s2 }
 0xc62   :  { %v1052_v48 = vpop.permute.xlu1 %1051 }
 0xc63   :  { %v1054_v49 = vmul.f32 %v2150_v47, %v1052_v48 }
 0xc65   :  { %1056 = vrot.lane.b32.xlu1 %v1054_v49, %s2253_s2 }
 0xcd3   :  { %v982_v52 = vpop.permute.xlu0 %981 }
 0xcd4   :  { %v2544_v54 = vadd.f32 %v982_v52, %v974_v51 }
 0xcd6   :  { %2151 = vtanh.f32 %v2544_v54 }
 0xcd7   :  { %v1057_v56 = vpop.permute.xlu1 %1056 }
 0xcd8   :  { %v2548_v57 = vadd.f32 %v1057_v56, %v1049_v55 }
 0xcda   :  { %2153 = vtanh.f32 %v2548_v57 }
 0xce0   :  { %v2152_v58 = vpop.eup %2151 }
 0xce1   :  { %987 = vrot.lane.b32.xlu0 %v2152_v58, %s2254_s12 }
 0xce4   :  { %v2154_v59 = vpop.eup %2153 }
 0xce5   :  { %1062 = vrot.lane.b32.xlu1 %v2154_v59, %s2254_s12 }
 0xd53   :  { %v988_v60 = vpop.permute.xlu0 %987 }
 0xd54   :  { %v2553_v61 = vmul.f32 %v2148_v44, %v988_v60 }
 0xd56   :  { %v1119_v62 = vpack.c.bf16 %v2553_v61, %v2553_v61 }
 0xd57   :  { %v1063_v63 = vpop.permute.xlu1 %1062 }
 0xd58   :  { %v2557_v5 = vmul.f32 %v2150_v47, %v1063_v63  ;;  %1121 = vrot.lane.b32.xlu0 %v1119_v62, %s2253_s2  ;;  %v1877_v63 = vld [vmem:[%s2948_s1 + $0x1] sm:$0x1] }
 0xd5a   :  { %v1194_v6 = vpack.c.bf16 %v2557_v5, %v2557_v5 }
 0xd5c   :  { %1196 = vrot.lane.b32.xlu1 %v1194_v6, %s2253_s2 }
 0xdca   :  { %v1122_v7 = vpop.permute.xlu0 %1121 }
 0xdcb   :  { %2018 = vmatmul.mubr.msk.bf16.vlgmr.msra.gmra.mrb[20].mxu0 %vm90_vm2, %v1122_v7 }
 0xdcc   :  { %2030 = vmatpush3.bf16.msra.mxu0 %v2304_v0  ;;  %2033 = vmatprep.mubr.msk.bf16.mxu0 %vm2252_vm0, %v2251_v1 }
 0xdcd   :  { %2031 = vmatprep.subr.bf16.mxu0 %v2251_v1 }
 0xdce   :  { %v1197_v8 = vpop.permute.xlu1 %1196 }
 0xdcf   :  { %2026 = vmatmul.mubr.msk.bf16.vlgmr.msra.gmra.mrb[20].mxu1 %vm90_vm2, %v1197_v8 }
 0xdd0   :  { %2032 = vmatpush3.bf16.msra.mxu0 %v2317_v3  ;;  %2038 = vmatpush3.bf16.msra.mxu1 %v2311_v2 }
 0xdd1   :  { %2039 = vmatprep.subr.bf16.mxu1 %v2251_v1  ;;  %2041 = vmatprep.mubr.msk.bf16.mxu1 %vm2252_vm0, %v2251_v1 }
 0xdd2   :  { %2045 = vmatprep.subr.bf16.mxu0 %v2251_v1 }
 0xdd4   :  { %2040 = vmatpush3.bf16.msra.mxu1 %v2326_v4 }
 0xdd5   :  { %2053 = vmatprep.subr.bf16.mxu1 %v2251_v1 }
 0xe9e   :  { %v1160_v13 = vpop.f32.mrb[20].mxu0 }
 0xe9f   :  { %v1166_v15 = vadd.f32 %v1160_v13, %v1118_v10  ;;  %v2019_v16 = vpop.f32.mrb[21].mxu0 }
 0xea0   :  { %v1163_v18 = vpop.f32.mrb[22].mxu0 }
 0xea1   :  { %2155 = vtanh.f32 %v1166_v15  ;;  %v2020_v19 = vpop.f32.mrb[23].mxu0  ;;  %v1870_v29 = vmul.f32 -1.442695, %v1166_v15 }
 0xea2   :  { %v1235_v20 = vpop.f32.mrb[20].mxu1 }
 0xea3   :  { %v1241_v21 = vadd.f32 %v1235_v20, %v1193_v17  ;;  %v2027_v23 = vpop.f32.mrb[21].mxu1 }
 0xea4   :  { %v1238_v24 = vpop.f32.mrb[22].mxu1 }
 0xea5   :  { %2157 = vtanh.f32 %v1241_v21  ;;  %v2028_v26 = vpop.f32.mrb[23].mxu1  ;;  %v1873_v30 = vmul.f32 -1.442695, %v1241_v21 }
 0xea6   :  { %2159 = vpow2.f32 %v1870_v29 }
 0xea7   :  { %2161 = vpow2.f32 %v1873_v30 }
 0xeab   :  { %v2156_v27 = vpop.eup %2155 }
 0xeac   :  { %1176 = vrot.lane.b32.xlu0 %v2156_v27, %s2254_s12 }
 0xeaf   :  { %v2158_v28 = vpop.eup %2157 }
 0xeb0   :  { %1251 = vrot.lane.b32.xlu1 %v2158_v28, %s2254_s12  ;;  %v2160_v31 = vpop.eup %2159 }
 0xeb1   :  { %v1170_v32 = vadd.f32 1.0, %v2160_v31  ;;  %v2162_v33 = vpop.eup %2161 }
 0xeb2   :  { %v1245_v34 = vadd.f32 1.0, %v2162_v33 }
 0xeb3   :  { %2163 = vrcp.f32 %v1170_v32 }
 0xeb4   :  { %2165 = vrcp.f32 %v1245_v34 }
 0xebd   :  { %v2164_v36 = vpop.eup %2163 }
 0xebe   :  { %v2166_v40 = vpop.eup %2165  ;;  %v1174_v43 = vmul.f32 %v2164_v36, %v2544_v54 }
 0xebf   :  { %v1249_v46 = vmul.f32 %v2166_v40, %v2548_v57 }
 0xf1e   :  { %v1177_v37 = vpop.permute.xlu0 %1176 }
 0xf1f   :  { %v1179_v39 = vmul.f32 %v2164_v36, %v1177_v37 }
 0xf21   :  { %1181 = vrot.lane.b32.xlu0 %v1179_v39, %s2253_s2 }
 0xf22   :  { %v1252_v41 = vpop.permute.xlu1 %1251 }
 0xf23   :  { %v1254_v42 = vmul.f32 %v2166_v40, %v1252_v41 }
 0xf25   :  { %1256 = vrot.lane.b32.xlu1 %v1254_v42, %s2253_s2 }
 0xf93   :  { %v1182_v44 = vpop.permute.xlu0 %1181 }
 0xf94   :  { %v2588_v45 = vadd.f32 %v1182_v44, %v1174_v43 }
 0xf96   :  { %2167 = vtanh.f32 %v2588_v45 }
 0xf97   :  { %v1257_v47 = vpop.permute.xlu1 %1256 }
 0xf98   :  { %v2592_v48 = vadd.f32 %v1257_v47, %v1249_v46 }
 0xf9a   :  { %2169 = vtanh.f32 %v2592_v48 }
 0xfa0   :  { %v2168_v49 = vpop.eup %2167 }
 0xfa1   :  { %1187 = vrot.lane.b32.xlu0 %v2168_v49, %s2254_s12  ;;  %v1880_v49 = vld [vmem:[%s2947_s0 + $0x7] sm:$0x1] }
 0xfa4   :  { %v2170_v51 = vpop.eup %2169 }
 0xfa5   :  { %1262 = vrot.lane.b32.xlu1 %v2170_v51, %s2254_s12  ;;  %v1518_v51 = vunpack.c.l.bf16 %v1880_v49  ;;  %v2256_v49 = vmov 1983009808  }
0x1013   :  { %v1188_v52 = vpop.permute.xlu0 %1187 }
0x1014   :  { %v2597_v54 = vmul.f32 %v2164_v36, %v1188_v52  ;;  %v1591_v52 = vld [vmem:[%s2948_s1] sm:$0x1] }
0x1016   :  { %v1319_v55 = vpack.c.bf16 %v2597_v54, %v2597_v54 }
0x1017   :  { %v1263_v56 = vpop.permute.xlu1 %1262 }
0x1018   :  { %v2601_v58 = vmul.f32 %v2166_v40, %v1263_v56  ;;  %1321 = vrot.lane.b32.xlu0 %v1319_v55, %s2253_s2 }
0x101a   :  { %v1394_v57 = vpack.c.bf16 %v2601_v58, %v2601_v58 }
0x101c   :  { %1396 = vrot.lane.b32.xlu1 %v1394_v57, %s2253_s2 }
0x108a   :  { %v1322_v59 = vpop.permute.xlu0 %1321 }
0x108b   :  { %2034 = vmatmul.mubr.msk.bf16.vlgmr.msra.gmra.mrb[24].mxu0 %vm90_vm2, %v1322_v59  ;;  %v1592_v59 = vunpack.c.l.bf16 %v1591_v52 }
0x108c   :  { %2046 = vmatpush3.bf16.msra.mxu0 %v2304_v0  ;;  %2049 = vmatprep.mubr.msk.bf16.mxu0 %vm2252_vm0, %v2251_v1  ;;  %v1874_v0 = vld [vmem:[%s2947_s0 + $0x6] sm:$0x1] }
0x108d   :  { %2047 = vmatprep.subr.bf16.mxu0 %v2251_v1  ;;  %v1318_v62 = vunpack.c.l.bf16 %v1874_v0 }
0x108e   :  { %v1397_v60 = vpop.permute.xlu1 %1396 }
0x108f   :  { %2042 = vmatmul.mubr.msk.bf16.vlgmr.msra.gmra.mrb[24].mxu1 %vm90_vm2, %v1397_v60 }
0x1090   :  { %2048 = vmatpush3.bf16.msra.mxu0 %v2317_v3  ;;  %2054 = vmatpush3.bf16.msra.mxu1 %v2311_v2  ;;  %v1393_v2 = vunpack.c.l.bf16 %v1877_v63 }
0x1091   :  { %2055 = vmatprep.subr.bf16.mxu1 %v2251_v1  ;;  %2057 = vmatprep.mubr.msk.bf16.mxu1 %vm2252_vm0, %v2251_v1 }
0x1094   :  { %2056 = vmatpush3.bf16.msra.mxu1 %v2326_v4 }
0x115e   :  { %v1360_v6 = vpop.f32.mrb[24].mxu0 }
0x115f   :  { %v1366_v3 = vadd.f32 %v1360_v6, %v1318_v62  ;;  %v2035_v7 = vpop.f32.mrb[25].mxu0 }
0x1160   :  { %v1363_v8 = vpop.f32.mrb[26].mxu0 }
0x1161   :  { %2171 = vtanh.f32 %v1366_v3  ;;  %v2036_v9 = vpop.f32.mrb[27].mxu0  ;;  %v1876_v17 = vmul.f32 -1.442695, %v1366_v3 }
0x1162   :  { %v1435_v10 = vpop.f32.mrb[24].mxu1 }
0x1163   :  { %v1441_v1 = vadd.f32 %v1435_v10, %v1393_v2  ;;  %v2043_v12 = vpop.f32.mrb[25].mxu1 }
0x1164   :  { %v1438_v4 = vpop.f32.mrb[26].mxu1 }
0x1165   :  { %2173 = vtanh.f32 %v1441_v1  ;;  %v2044_v13 = vpop.f32.mrb[27].mxu1  ;;  %v1879_v18 = vmul.f32 -1.442695, %v1441_v1 }
0x1166   :  { %2175 = vpow2.f32 %v1876_v17  ;;  %v2255_v13 = vmov 1966171168  }
0x1167   :  { %2177 = vpow2.f32 %v1879_v18 }
0x116b   :  { %v2172_v15 = vpop.eup %2171 }
0x116c   :  { %1376 = vrot.lane.b32.xlu0 %v2172_v15, %s2254_s12  ;;  %v267_v15 = vunpack.c.l.s4 %v2255_v13 }
0x116e   :  { %v268_v18 = vunpack.c.0.s8 %v267_v15 }
0x116f   :  { %v2174_v16 = vpop.eup %2173 }
0x1170   :  { %1451 = vrot.lane.b32.xlu1 %v2174_v16, %s2254_s12  ;;  %v2176_v19 = vpop.eup %2175  ;;  %v269_v16 = vlaneseq }
0x1171   :  { %v1370_v20 = vadd.f32 1.0, %v2176_v19  ;;  %v2178_v21 = vpop.eup %2177 }
0x1172   :  { %v1445_v23 = vadd.f32 1.0, %v2178_v21  ;;  %v270_v19 = vshrl.u32 %v269_v16, 7 }
0x1173   :  { %2179 = vrcp.f32 %v1370_v20 }
0x1174   :  { %2181 = vrcp.f32 %v1445_v23  ;;  %v2659_v20 = vsub.s32 %v268_v18, %v270_v19 }
0x1176   :  { %v1073_v13 = vrot.slane %v2553_v61, %v2659_v20 }
0x117d   :  { %v2180_v24 = vpop.eup %2179 }
0x117e   :  { %v2182_v28 = vpop.eup %2181  ;;  %v1374_v31 = vmul.f32 %v2180_v24, %v2588_v45 }
0x117f   :  { %v1449_v34 = vmul.f32 %v2182_v28, %v2592_v48 }
0x11de   :  { %v1377_v26 = vpop.permute.xlu0 %1376 }
0x11df   :  { %v1379_v27 = vmul.f32 %v2180_v24, %v1377_v26  ;;  %v272_v26 = vrot.slane %v2377_v50, %v2659_v20 }
0x11e1   :  { %1381 = vrot.lane.b32.xlu0 %v1379_v27, %s2253_s2 }
0x11e2   :  { %v1452_v29 = vpop.permute.xlu1 %1451 }
0x11e3   :  { %v1454_v30 = vmul.f32 %v2182_v28, %v1452_v29 }
0x11e5   :  { %1456 = vrot.lane.b32.xlu1 %v1454_v30, %s2253_s2  ;;  %v273_v30 = vcombine.high %v272_v26, %v272_v26 }
0x1253   :  { %v1382_v32 = vpop.permute.xlu0 %1381 }
0x1254   :  { %v2630_v33 = vadd.f32 %v1382_v32, %v1374_v31 }
0x1256   :  { %2183 = vtanh.f32 %v2630_v33 }
0x1257   :  { %v1457_v36 = vpop.permute.xlu1 %1456 }
0x1258   :  { %v2634_v37 = vadd.f32 %v1457_v36, %v1449_v34 }
0x125a   :  { %2185 = vtanh.f32 %v2634_v37 }
0x1260   :  { %v2184_v39 = vpop.eup %2183 }
0x1261   :  { %1387 = vrot.lane.b32.xlu0 %v2184_v39, %s2254_s12 }
0x1264   :  { %v2186_v40 = vpop.eup %2185 }
0x1265   :  { %1462 = vrot.lane.b32.xlu1 %v2186_v40, %s2254_s12 }
0x12d3   :  { %v1388_v41 = vpop.permute.xlu0 %1387 }
0x12d4   :  { %v2639_v42 = vmul.f32 %v2180_v24, %v1388_v41  ;;  %v2663_v24 = vsub.s32 0, %v270_v19 }
0x12d6   :  { %v1519_v43 = vpack.c.bf16 %v2639_v42, %v2639_v42  ;;  %v277_v32 = vrot.slane %v272_v26, %v2663_v24  ;;  %v281_v34 = vrot.slane %v273_v30, %v2663_v24 }
0x12d7   :  { %v1463_v44 = vpop.permute.xlu1 %1462 }
0x12d8   :  { %v2643_v45 = vmul.f32 %v2182_v28, %v1463_v44  ;;  %1521 = vrot.lane.b32.xlu0 %v1519_v43, %s2253_s2 }
0x12da   :  { %v1593_v46 = vpack.c.bf16 %v2643_v45, %v2643_v45 }
0x12dc   :  { %1595 = vrot.lane.b32.xlu1 %v1593_v46, %s2253_s2 }
0x134a   :  { %v1522_v47 = vpop.permute.xlu0 %1521 }
0x134b   :  { %2050 = vmatmul.mubr.msk.bf16.vlgmr.msra.gmra.mrb[28].mxu0 %vm90_vm2, %v1522_v47 }
0x134e   :  { %v1596_v48 = vpop.permute.xlu1 %1595 }
0x134f   :  { %2058 = vmatmul.mubr.msk.bf16.vlgmr.msra.gmra.mrb[28].mxu1 %vm90_vm2, %v1596_v48 }
0x141e   :  { %v1560_v55 = vpop.f32.mrb[28].mxu0 }
0x141f   :  { %v1566_v56 = vadd.f32 %v1560_v55, %v1518_v51  ;;  %v2051_v57 = vpop.f32.mrb[29].mxu0  ;;  %v1716_v51 = vunpack.c.l.s4 %v2256_v49 }
0x1420   :  { %v1563_v60 = vpop.f32.mrb[30].mxu0 }
0x1421   :  { %2187 = vtanh.f32 %v1566_v56  ;;  %v2052_v0 = vpop.f32.mrb[31].mxu0  ;;  %v1882_v9 = vmul.f32 -1.442695, %v1566_v56  ;;  %v1717_v57 = vunpack.c.0.s8 %v1716_v51 }
0x1422   :  { %v1634_v62 = vpop.f32.mrb[28].mxu1 }
0x1423   :  { %v1640_v63 = vadd.f32 %v1634_v62, %v1592_v59  ;;  %v2059_v6 = vpop.f32.mrb[29].mxu1  ;;  %v673_v62 = vrot.slane %v2465_v22, %v2659_v20 }
0x1424   :  { %v1637_v3 = vpop.f32.mrb[30].mxu1 }
0x1425   :  { %2189 = vtanh.f32 %v1640_v63  ;;  %v2060_v7 = vpop.f32.mrb[31].mxu1  ;;  %v1884_v10 = vmul.f32 -1.442695, %v1640_v63  ;;  %v2706_v63 = vsub.s32 %v1717_v57, %v270_v19  ;;  %v698_v3 = vrot.slane %v2469_v25, %v2659_v20 }
0x1426   :  { %2191 = vpow2.f32 %v1882_v9 }
0x1427   :  { %2193 = vpow2.f32 %v1884_v10  ;;  %v699_v22 = vcombine.high %v698_v3, %v698_v3  ;;  %v703_v16 = vrot.slane %v698_v3, %v2663_v24 }
0x142b   :  { %v2188_v2 = vpop.eup %2187 }
0x142c   :  { %1576 = vrot.lane.b32.xlu0 %v2188_v2, %s2254_s12 }
0x142f   :  { %v2190_v8 = vpop.eup %2189 }
0x1430   :  { %1650 = vrot.lane.b32.xlu1 %v2190_v8, %s2254_s12  ;;  %v2192_v1 = vpop.eup %2191  ;;  %v873_v8 = vrot.slane %v2509_v11, %v2659_v20 }
0x1431   :  { %v1570_v12 = vadd.f32 1.0, %v2192_v1  ;;  %v2194_v4 = vpop.eup %2193  ;;  %v898_v1 = vrot.slane %v2513_v14, %v2659_v20  ;;  %v1074_v14 = vcombine.high %v1073_v13, %v1073_v13 }
0x1432   :  { %v1644_v17 = vadd.f32 1.0, %v2194_v4  ;;  %v874_v25 = vcombine.high %v873_v8, %v873_v8  ;;  %v678_v4 = vrot.slane %v673_v62, %v2663_v24  ;;  %v878_v19 = vrot.slane %v873_v8, %v2663_v24 }
0x1433   :  { %2195 = vrcp.f32 %v1570_v12  ;;  %v707_v12 = vrot.slane %v699_v22, %v2663_v24  ;;  %v899_v11 = vcombine.high %v898_v1, %v898_v1  ;;  %v1082_v26 = vrot.slane %v1074_v14, %v2663_v24 }
0x1434   :  { %2197 = vrcp.f32 %v1644_v17  ;;  %v882_v15 = vrot.slane %v874_v25, %v2663_v24  ;;  %v1098_v17 = vrot.slane %v2557_v5, %v2659_v20 }
0x1435   :  { %v907_v18 = vrot.slane %v899_v11, %v2663_v24 }
0x1436   :  { %v1099_v61 = vcombine.high %v1098_v17, %v1098_v17 }
0x1438   :  { %v1107_v30 = vrot.slane %v1099_v61, %v2663_v24 }
0x143d   :  { %v2661_v21 = vpop.eup %2195 }
0x143e   :  { %v2669_v28 = vpop.eup %2197  ;;  %v1574_v50 = vmul.f32 %v2661_v21, %v2630_v33  ;;  %v298_v33 = vrot.slane %v2381_v53, %v2659_v20  ;;  %v498_v53 = vrot.slane %v2425_v38, %v2659_v20  ;;  %v674_v38 = vcombine.high %v673_v62, %v673_v62 }
0x143f   :  { %v1648_v40 = vmul.f32 %v2669_v28, %v2634_v37  ;;  %v473_v37 = vrot.slane %v2421_v35, %v2659_v20 }
0x1440   :  { %v299_v48 = vcombine.high %v298_v33, %v298_v33  ;;  %v303_v52 = vrot.slane %v298_v33, %v2663_v24  ;;  %v499_v0 = vcombine.high %v498_v53, %v498_v53  ;;  %v503_v6 = vrot.slane %v498_v53, %v2663_v24 }
0x1441   :  { %v474_v56 = vcombine.high %v473_v37, %v473_v37  ;;  %v478_v60 = vrot.slane %v473_v37, %v2663_v24  ;;  %v682_v10 = vrot.slane %v674_v38, %v2663_v24 }
0x1442   :  { %v307_v59 = vrot.slane %v299_v48, %v2663_v24  ;;  %v507_v2 = vrot.slane %v499_v0, %v2663_v24 }
0x1443   :  { %v482_v35 = vrot.slane %v474_v56, %v2663_v24 }
0x149e   :  { %v1577_v23 = vpop.permute.xlu0 %1576 }
0x149f   :  { %v1579_v27 = vmul.f32 %v2661_v21, %v1577_v23  ;;  %v1273_v23 = vrot.slane %v2597_v54, %v2659_v20 }
0x14a1   :  { %1581 = vrot.lane.b32.xlu0 %v1579_v27, %s2253_s2  ;;  %v903_v27 = vrot.slane %v898_v1, %v2663_v24  ;;  %v1274_v5 = vcombine.high %v1273_v23, %v1273_v23 }
0x14a2   :  { %v1651_v29 = vpop.permute.xlu1 %1650 }
0x14a3   :  { %v1653_v31 = vmul.f32 %v2669_v28, %v1651_v29  ;;  %v1298_v29 = vrot.slane %v2601_v58, %v2659_v20 }
0x14a5   :  { %1655 = vrot.lane.b32.xlu1 %v1653_v31, %s2253_s2  ;;  %282 = vrot.lane.b32.xlu0 %v277_v32, %s2253_s2  ;;  %v1078_v31 = vrot.slane %v1073_v13, %v2663_v24  ;;  %v1299_v54 = vcombine.high %v1298_v29, %v1298_v29  ;;  %v1473_v32 = vrot.slane %v2639_v42, %v2659_v20 }
0x14a7   :  { %v1474_v58 = vcombine.high %v1473_v32, %v1473_v32 }
0x14a9   :  { %284 = vrot.lane.b32.xlu1 %v281_v34, %s2253_s2  ;;  %v1282_v34 = vrot.slane %v1274_v5, %v2663_v24 }
0x1513   :  { %v1582_v36 = vpop.permute.xlu0 %1581 }
0x1514   :  { %v1584_v39 = vadd.f32 %v1582_v36, %v1574_v50  ;;  %v1103_v50 = vrot.slane %v1098_v17, %v2663_v24  ;;  %v1498_v36 = vrot.slane %v2643_v45, %v2659_v20  ;;  %v1478_v45 = vrot.slane %v1473_v32, %v2663_v24 }
0x1516   :  { %2199 = vtanh.f32 %v1584_v39  ;;  %v1734_v7 = vrot.slane %v1584_v39, %v2706_v63  ;;  %v1307_v39 = vrot.slane %v1299_v54, %v2663_v24  ;;  %v1499_v42 = vcombine.high %v1498_v36, %v1498_v36 }
0x1517   :  { %v1656_v41 = vpop.permute.xlu1 %1655  ;;  %v283_v43 = vpop.permute.xlu0 %282 }
0x1518   :  { %v1658_v44 = vadd.f32 %v1656_v41, %v1648_v40  ;;  %289 = vst.msk [vmem:[%s2951_s4] sm:$0x1] %vm288_vm3, %v283_v43  ;;  %v1278_v40 = vrot.slane %v1273_v23, %v2663_v24  ;;  %v1482_v41 = vrot.slane %v1474_v58, %v2663_v24  ;;  %v1303_v43 = vrot.slane %v1298_v29, %v2663_v24 }
0x151a   :  { %2201 = vtanh.f32 %v1658_v44  ;;  %v1757_v9 = vrot.slane %v1658_v44, %v2706_v63  ;;  %v1507_v44 = vrot.slane %v1499_v42, %v2663_v24 }
0x151b   :  { %v285_v46 = vpop.permute.xlu1 %284 }
0x151c   :  { %290 = vst.msk [vmem:[%s2951_s4 + $0x8] sm:$0x1] %vm288_vm3, %v285_v46  ;;  %v1503_v46 = vrot.slane %v1498_v36, %v2663_v24 }
0x1520   :  { %v2200_v47 = vpop.eup %2199 }
0x1521   :  { %1587 = vrot.lane.b32.xlu0 %v2200_v47, %s2254_s12 }
0x1524   :  { %v2202_v55 = vpop.eup %2201 }
0x1525   :  { %1661 = vrot.lane.b32.xlu1 %v2202_v55, %s2254_s12  ;;  %308 = vrot.lane.b32.xlu0 %v303_v52, %s2253_s2  ;;  %s2257_s12 = smov 96  }
0x1529   :  { %310 = vrot.lane.b32.xlu1 %v307_v59, %s2253_s2  ;;  %483 = vrot.lane.b32.xlu0 %v478_v60, %s2253_s2 }
0x152d   :  { %485 = vrot.lane.b32.xlu1 %v482_v35, %s2253_s2  ;;  %508 = vrot.lane.b32.xlu0 %v503_v6, %s2253_s2 }
0x1531   :  { %510 = vrot.lane.b32.xlu1 %v507_v2, %s2253_s2  ;;  %1735 = vrot.lane.b32.xlu0 %v1734_v7, %s2257_s12 }
0x1535   :  { %685 = vrot.lane.b32.xlu1 %v682_v10, %s2253_s2  ;;  %1758 = vrot.lane.b32.xlu0 %v1757_v9, %s2257_s12 }
0x1539   :  { %710 = vrot.lane.b32.xlu1 %v707_v12, %s2253_s2  ;;  %683 = vrot.lane.b32.xlu0 %v678_v4, %s2253_s2 }
0x153d   :  { %885 = vrot.lane.b32.xlu1 %v882_v15, %s2253_s2  ;;  %708 = vrot.lane.b32.xlu0 %v703_v16, %s2253_s2 }
0x1541   :  { %910 = vrot.lane.b32.xlu1 %v907_v18, %s2253_s2  ;;  %883 = vrot.lane.b32.xlu0 %v878_v19, %s2253_s2 }
0x1545   :  { %1085 = vrot.lane.b32.xlu1 %v1082_v26, %s2253_s2  ;;  %908 = vrot.lane.b32.xlu0 %v903_v27, %s2253_s2 }
0x1549   :  { %1110 = vrot.lane.b32.xlu1 %v1107_v30, %s2253_s2  ;;  %1083 = vrot.lane.b32.xlu0 %v1078_v31, %s2253_s2 }
0x154d   :  { %1285 = vrot.lane.b32.xlu1 %v1282_v34, %s2253_s2  ;;  %1108 = vrot.lane.b32.xlu0 %v1103_v50, %s2253_s2 }
0x1551   :  { %1310 = vrot.lane.b32.xlu1 %v1307_v39, %s2253_s2  ;;  %1283 = vrot.lane.b32.xlu0 %v1278_v40, %s2253_s2 }
0x1555   :  { %1485 = vrot.lane.b32.xlu1 %v1482_v41, %s2253_s2  ;;  %1308 = vrot.lane.b32.xlu0 %v1303_v43, %s2253_s2 }
0x1559   :  { %1510 = vrot.lane.b32.xlu1 %v1507_v44, %s2253_s2  ;;  %1483 = vrot.lane.b32.xlu0 %v1478_v45, %s2253_s2 }
0x155d   :  { %1508 = vrot.lane.b32.xlu0 %v1503_v46, %s2253_s2 }
0x1593   :  { %v1588_v33 = vpop.permute.xlu0 %1587 }
0x1594   :  { %v1590_v47 = vmul.f32 %v2661_v21, %v1588_v33 }
0x1596   :  { %v1672_v37 = vrot.slane %v1590_v47, %v2659_v20  ;;  %v1721_v48 = vrot.slane %v1590_v47, %v2706_v63 }
0x1597   :  { %v1662_v49 = vpop.permute.xlu1 %1661  ;;  %v309_v51 = vpop.permute.xlu0 %308 }
0x1598   :  { %v1664_v52 = vmul.f32 %v2669_v28, %v1662_v49  ;;  %314 = vst.msk [vmem:[%s2952_s5 + $0x7] sm:$0x1] %vm288_vm3, %v309_v51  ;;  %1722 = vrot.lane.b32.xlu1 %v1721_v48, %s2253_s2  ;;  %v1677_v55 = vrot.slane %v1672_v37, %v2663_v24  ;;  %v1673_v56 = vcombine.high %v1672_v37, %v1672_v37 }
0x159a   :  { %v1697_v21 = vrot.slane %v1664_v52, %v2659_v20  ;;  %v1745_v53 = vrot.slane %v1664_v52, %v2706_v63  ;;  %1682 = vrot.lane.b32.xlu0 %v1677_v55, %s2253_s2  ;;  %v1681_v60 = vrot.slane %v1673_v56, %v2663_v24 }
0x159b   :  { %v311_v57 = vpop.permute.xlu1 %310  ;;  %v484_v59 = vpop.permute.xlu0 %483 }
0x159c   :  { %v1702_v28 = vrot.slane %v1697_v21, %v2663_v24  ;;  %315 = vst.msk [vmem:[%s2952_s5 + $0xf] sm:$0x1] %vm288_vm3, %v311_v57  ;;  %489 = vst.msk [vmem:[%s2951_s4 + $0x1] sm:$0x1] %vm288_vm3, %v484_v59  ;;  %1746 = vrot.lane.b32.xlu1 %v1745_v53, %s2253_s2  ;;  %v1698_v20 = vcombine.high %v1697_v21, %v1697_v21 }
0x159e   :  { %1707 = vrot.lane.b32.xlu0 %v1702_v28, %s2253_s2  ;;  %v1706_v62 = vrot.slane %v1698_v20, %v2663_v24 }
0x159f   :  { %v486_v35 = vpop.permute.xlu1 %485  ;;  %v509_v0 = vpop.permute.xlu0 %508 }
0x15a0   :  { %490 = vst.msk [vmem:[%s2951_s4 + $0x9] sm:$0x1] %vm288_vm3, %v486_v35  ;;  %514 = vst.msk [vmem:[%s2952_s5 + $0x6] sm:$0x1] %vm288_vm3, %v509_v0  ;;  %1684 = vrot.lane.b32.xlu1 %v1681_v60, %s2253_s2 }
0x15a3   :  { %v511_v63 = vpop.permute.xlu1 %510  ;;  %v1736_v6 = vpop.permute.xlu0 %1735 }
0x15a4   :  { %515 = vst.msk [vmem:[%s2952_s5 + $0xe] sm:$0x1] %vm288_vm3, %v511_v63  ;;  %1709 = vrot.lane.b32.xlu1 %v1706_v62, %s2253_s2 }
0x15a5   :  { %1738 = vst.msk [vmem:[#allocation3] sm:$0x3] %vm58_vm1, %v1736_v6  ;;  %1768 = vst.msk [vmem:[#allocation8] sm:$0x3] %vm58_vm1, %v1736_v6 }
0x15a7   :  { %v686_v38 = vpop.permute.xlu1 %685  ;;  %v1759_v3 = vpop.permute.xlu0 %1758 }
0x15a8   :  { %690 = vst.msk [vmem:[%s2951_s4 + $0xa] sm:$0x1] %vm288_vm3, %v686_v38 }
0x15a9   :  { %1761 = vst.msk [vmem:[#allocation5] sm:$0x3] %vm58_vm1, %v1759_v3  ;;  %1770 = vst.msk [vmem:[#allocation8 + $0x2] sm:$0x3] %vm58_vm1, %v1759_v3 }
0x15aa   :  { %2214 = shalt.err (!%p2211_p4)
}
0x15ab   :  { %s2215_s16 = scalar_lea.hbm %s2954_s7, 64 }
0x15ac   :  { %p2216_p5 = scmp.ne.s32.totalorder %s2954_s7, %s2215_s16  ;;  %p2219_p6 = scmp.lt.u32.totalorder %s2215_s16, %s2954_s7 }
0x15ae   :  { %p2221_p7 = pnand %p2219_p6, %p2216_p5 }
0x15b0   :  { %2224 = shalt.err (!%p2221_p7)
}
0x15b1   :  { %s2259_s19 = smov 2   ;;  %v711_v24 = vpop.permute.xlu1 %710  ;;  %v684_v7 = vpop.permute.xlu0 %683  ;;  %s2260_s3 = smov [#allocation6]  }
0x15b2   :  { %1804 = dma.vmem_to_hbm [thread:$0]  %s1799_s8, 64, %s2954_s7, [#allocation9], %s2253_s2, %s2253_s2, %s2259_s19  }
0x15b3   :  { %715 = vst.msk [vmem:[%s2952_s5 + $0xd] sm:$0x1] %vm288_vm3, %v711_v24  ;;  %689 = vst.msk [vmem:[%s2951_s4 + $0x2] sm:$0x1] %vm288_vm3, %v684_v7  ;;  %s1786_s9 = sshll.u32 %s2260_s3, 4  ;;  %s1787_s9 = int_to_ptr.vmem [resolvable:$true] %s1786_s9 }
0x15b4   :  { %s2225_s13 = scalar_lea.vmem %s1787_s9, 64  ;;  %p2230_p9 = scmp.lt.s32.totalorder %s1787_s9, %s1787_s9 }
0x15b5   :  { %v886_v2 = vpop.permute.xlu1 %885  ;;  %v709_v22 = vpop.permute.xlu0 %708  ;;  %p2226_p8 = scmp.ne.s32.totalorder %s1787_s9, %s2225_s13  ;;  %p2231_p10 = scmp.lt.s32.totalorder %s2225_s13, %s2225_s13 }
0x15b6   :  { %890 = vst.msk [vmem:[%s2951_s4 + $0xb] sm:$0x1] %vm288_vm3, %v886_v2  ;;  %714 = vst.msk [vmem:[%s2952_s5 + $0x5] sm:$0x1] %vm288_vm3, %v709_v22 }
0x15b7   :  { %p2232_p11 = por %p2231_p10, %p2230_p9 }
0x15b9   :  { %v911_v8 = vpop.permute.xlu1 %910  ;;  %v884_v9 = vpop.permute.xlu0 %883  ;;  %p2233_p12 = pnand %p2232_p11, %p2226_p8 }
0x15ba   :  { %915 = vst.msk [vmem:[%s2952_s5 + $0xc] sm:$0x1] %vm288_vm3, %v911_v8  ;;  %889 = vst.msk [vmem:[%s2951_s4 + $0x3] sm:$0x1] %vm288_vm3, %v884_v9 }
0x15bd   :  { %v1086_v10 = vpop.permute.xlu1 %1085  ;;  %v909_v25 = vpop.permute.xlu0 %908 }
0x15be   :  { %1090 = vst.msk [vmem:[%s2951_s4 + $0xc] sm:$0x1] %vm288_vm3, %v1086_v10  ;;  %914 = vst.msk [vmem:[%s2952_s5 + $0x4] sm:$0x1] %vm288_vm3, %v909_v25 }
0x15c1   :  { %v1111_v1 = vpop.permute.xlu1 %1110  ;;  %v1084_v12 = vpop.permute.xlu0 %1083 }
0x15c2   :  { %1115 = vst.msk [vmem:[%s2952_s5 + $0xb] sm:$0x1] %vm288_vm3, %v1111_v1  ;;  %1089 = vst.msk [vmem:[%s2951_s4 + $0x4] sm:$0x1] %vm288_vm3, %v1084_v12 }
0x15c5   :  { %v1286_v4 = vpop.permute.xlu1 %1285  ;;  %v1109_v11 = vpop.permute.xlu0 %1108 }
0x15c6   :  { %1290 = vst.msk [vmem:[%s2951_s4 + $0xd] sm:$0x1] %vm288_vm3, %v1286_v4  ;;  %1114 = vst.msk [vmem:[%s2952_s5 + $0x3] sm:$0x1] %vm288_vm3, %v1109_v11 }
0x15c9   :  { %v1311_v13 = vpop.permute.xlu1 %1310  ;;  %v1284_v15 = vpop.permute.xlu0 %1283 }
0x15ca   :  { %1315 = vst.msk [vmem:[%s2952_s5 + $0xa] sm:$0x1] %vm288_vm3, %v1311_v13  ;;  %1289 = vst.msk [vmem:[%s2951_s4 + $0x5] sm:$0x1] %vm288_vm3, %v1284_v15 }
0x15cd   :  { %v1486_v16 = vpop.permute.xlu1 %1485  ;;  %v1309_v14 = vpop.permute.xlu0 %1308 }
0x15ce   :  { %1490 = vst.msk [vmem:[%s2951_s4 + $0xe] sm:$0x1] %vm288_vm3, %v1486_v16  ;;  %1314 = vst.msk [vmem:[%s2952_s5 + $0x2] sm:$0x1] %vm288_vm3, %v1309_v14 }
0x15d1   :  { %v1511_v17 = vpop.permute.xlu1 %1510  ;;  %v1484_v18 = vpop.permute.xlu0 %1483 }
0x15d2   :  { %1515 = vst.msk [vmem:[%s2952_s5 + $0x9] sm:$0x1] %vm288_vm3, %v1511_v17  ;;  %1489 = vst.msk [vmem:[%s2951_s4 + $0x6] sm:$0x1] %vm288_vm3, %v1484_v18 }
0x15d5   :  { %v1509_v19 = vpop.permute.xlu0 %1508 }
0x15d6   :  { %1514 = vst.msk [vmem:[%s2952_s5 + $0x1] sm:$0x1] %vm288_vm3, %v1509_v19 }
0x160a   :  { %v1723_v61 = vpop.permute.xlu1 %1722 }
0x160b   :  { %1726 = vst.msk [vmem:[#allocation2] sm:$0x3] %vm58_vm1, %v1723_v61  ;;  %1765 = vst.msk [vmem:[#allocation6] sm:$0x3] %vm58_vm1, %v1723_v61 }
0x160c   :  { %v1683_v23 = vpop.permute.xlu0 %1682 }
0x160d   :  { %1688 = vst.msk [vmem:[%s2951_s4 + $0x7] sm:$0x1] %vm288_vm3, %v1683_v23 }
0x160e   :  { %v1747_v26 = vpop.permute.xlu1 %1746 }
0x160f   :  { %1749 = vst.msk [vmem:[#allocation4] sm:$0x3] %vm58_vm1, %v1747_v26  ;;  %1767 = vst.msk [vmem:[#allocation6 + $0x2] sm:$0x3] %vm58_vm1, %v1747_v26 }
0x1610   :  { %v1708_v27 = vpop.permute.xlu0 %1707 }
0x1611   :  { %2236 = shalt.err (!%p2233_p12)
}
0x1612   :  { %s2237_s16 = scalar_lea.hbm %s2953_s6, 64 }
0x1613   :  { %p2238_p13 = scmp.ne.s32.totalorder %s2953_s6, %s2237_s16  ;;  %p2241_p0 = scmp.lt.u32.totalorder %s2237_s16, %s2953_s6 }
0x1615   :  { %p2243_p1 = pnand %p2241_p0, %p2238_p13 }
0x1617   :  { %2246 = shalt.err (!%p2243_p1)
}
0x1618   :  { %1792 = dma.vmem_to_hbm [thread:$0]  %s1787_s9, 64, %s2953_s6, [#allocation7], %s2253_s2, %s2253_s2, %s2259_s19   ;;  %v1685_v5 = vpop.permute.xlu1 %1684 }
0x1619   :  { %1713 = vst.msk [vmem:[%s2952_s5] sm:$0x1] %vm288_vm3, %v1708_v27  ;;  %1689 = vst.msk [vmem:[%s2951_s4 + $0xf] sm:$0x1] %vm288_vm3, %v1685_v5 }
0x161c   :  { %v1710_v29 = vpop.permute.xlu1 %1709 }
0x161d   :  { %1714 = vst.msk [vmem:[%s2952_s5 + $0x8] sm:$0x1] %vm288_vm3, %v1710_v29 }
0x161e   :  { %2247 = dma.done.wait [#allocation7], 64  }
0x161f   :  { %2248 = vsyncadd [#allocation7], 4294967232 }
0x1620   :  { %2249 = dma.done.wait [#allocation9], 64  }
0x1621   :  { %2250 = vsyncadd [#allocation9], 4294967232 }
0x1622   :  { %1820 = vsyncpa [#allocation7], 1 }
0x1623   :  { %1821 = vsyncpa [#allocation9], 1 }

</bundles_post_ra>
